<compile_context>
chip_gen: v7x
topology: tpu7x:2x2x1
jax: 0.10.0
libtpu: 0.0.40
codegen_flags: <defaults>
</compile_context>

<pallas_src>
import functools

import numpy as np
import jax
import jax.numpy as jnp
from jax.experimental import pallas as pl
from jax.experimental.pallas import tpu as pltpu


def _round_up(n: int, m: int) -> int:
    return ((n + m - 1) // m) * m


# --------------------------------------------------------------------------------------
# Positional-encoding buffer (identical math to the PyTorch PositionalEncoding.__init__)
# --------------------------------------------------------------------------------------
def make_positional_encoding(d_model: int, max_len: int = 5000) -> jnp.ndarray:
    position = np.arange(max_len, dtype=np.float32)[:, None]                 # (max_len, 1)
    div_term = np.exp(np.arange(0, d_model, 2, dtype=np.float32)
                      * (-np.log(10000.0) / d_model))                        # (d_model/2,)
    pe = np.zeros((max_len, d_model), dtype=np.float32)
    pe[:, 0::2] = np.sin(position * div_term)
    pe[:, 1::2] = np.cos(position * div_term)
    return jnp.asarray(pe)                                                   # (max_len, d_model)


def _pad_rows(x2d, tm):
    R = x2d.shape[0]
    r_pad = _round_up(R, tm)
    if r_pad != R:
        x2d = jnp.pad(x2d, ((0, r_pad - R), (0, 0)))
    return x2d, r_pad


# --------------------------------------------------------------------------------------
# Generic row-tiled Linear (matmul + bias, optional fused ReLU)
# --------------------------------------------------------------------------------------
def _linear_kernel(x_ref, w_ref, b_ref, o_ref, *, activation):
    acc = jnp.dot(x_ref[...], w_ref[...], preferred_element_type=jnp.float32)
    acc = acc + b_ref[...].astype(jnp.float32)
    if activation == "relu":
        acc = jnp.maximum(acc, 0.0)
    o_ref[...] = acc.astype(o_ref.dtype)


def linear(x2d, w, b, *, activation=None, tile_rows=256):
    """x2d: (R, K) flattened rows; w: (K, N); b: (N,).  Returns (R, N)."""
    R, K = x2d.shape
    Kw, N = w.shape
    assert K == Kw
    tm = min(tile_rows, _round_up(R, 8))
    x2d, r_pad = _pad_rows(x2d, tm)
    out = pl.pallas_call(
        functools.partial(_linear_kernel, activation=activation),
        out_shape=jax.ShapeDtypeStruct((r_pad, N), x2d.dtype),
        grid_spec=pl.GridSpec(
            grid=(r_pad // tm,),
            in_specs=[
                pl.BlockSpec((tm, K), lambda i: (i, 0)),
                pl.BlockSpec((K, N), lambda i: (0, 0)),
                pl.BlockSpec((1, N), lambda i: (0, 0)),
            ],
            out_specs=pl.BlockSpec((tm, N), lambda i: (i, 0)),
        ),
        compiler_params=pltpu.CompilerParams(dimension_semantics=("parallel",)),
    )(x2d, w, b.reshape(1, N))
    return out[:R]


# --------------------------------------------------------------------------------------
# input_projection fused with positional-encoding add:  out = x @ W + b + pe[:S]
# --------------------------------------------------------------------------------------
def _proj_pe_kernel(x_ref, w_ref, b_ref, pe_ref, o_ref):
    acc = jnp.dot(x_ref[0], w_ref[...], preferred_element_type=jnp.float32)
    acc = acc + b_ref[...].astype(jnp.float32) + pe_ref[...].astype(jnp.float32)
    o_ref[0] = acc.astype(o_ref.dtype)


def input_projection_with_pe(x, w, b, pe):
    """x: (B, S, Din); w: (Din, Ht); b: (Ht,); pe: (S, Ht) already cast to x.dtype."""
    B, S, Din = x.shape
    Ht = w.shape[1]
    return pl.pallas_call(
        _proj_pe_kernel,
        out_shape=jax.ShapeDtypeStruct((B, S, Ht), x.dtype),
        grid_spec=pl.GridSpec(
            grid=(B,),
            in_specs=[
                pl.BlockSpec((1, S, Din), lambda bb: (bb, 0, 0)),
                pl.BlockSpec((Din, Ht), lambda bb: (0, 0)),
                pl.BlockSpec((1, Ht), lambda bb: (0, 0)),
                pl.BlockSpec((S, Ht), lambda bb: (0, 0)),
            ],
            out_specs=pl.BlockSpec((1, S, Ht), lambda bb: (bb, 0, 0)),
        ),
        compiler_params=pltpu.CompilerParams(dimension_semantics=("parallel",)),
    )(x, w, b.reshape(1, Ht), pe)


# --------------------------------------------------------------------------------------
# Fused Q/K/V projection: three matmuls + biases in one kernel (x tile loaded once)
# --------------------------------------------------------------------------------------
def _qkv_kernel(x_ref, wq_ref, wk_ref, wv_ref, bq_ref, bk_ref, bv_ref,
                q_ref, k_ref, v_ref):
    x = x_ref[...]
    q_ref[...] = (jnp.dot(x, wq_ref[...], preferred_element_type=jnp.float32)
                  + bq_ref[...].astype(jnp.float32)).astype(q_ref.dtype)
    k_ref[...] = (jnp.dot(x, wk_ref[...], preferred_element_type=jnp.float32)
                  + bk_ref[...].astype(jnp.float32)).astype(k_ref.dtype)
    v_ref[...] = (jnp.dot(x, wv_ref[...], preferred_element_type=jnp.float32)
                  + bv_ref[...].astype(jnp.float32)).astype(v_ref.dtype)


def qkv_projection(x2d, wq, wk, wv, bq, bk, bv, *, tile_rows=256):
    R, E = x2d.shape
    tm = min(tile_rows, _round_up(R, 8))
    x2d, r_pad = _pad_rows(x2d, tm)
    row_spec = pl.BlockSpec((tm, E), lambda i: (i, 0))
    w_spec = pl.BlockSpec((E, E), lambda i: (0, 0))
    b_spec = pl.BlockSpec((1, E), lambda i: (0, 0))
    q, k, v = pl.pallas_call(
        _qkv_kernel,
        out_shape=(jax.ShapeDtypeStruct((r_pad, E), x2d.dtype),) * 3,
        grid_spec=pl.GridSpec(
            grid=(r_pad // tm,),
            in_specs=[row_spec, w_spec, w_spec, w_spec, b_spec, b_spec, b_spec],
            out_specs=(row_spec, row_spec, row_spec),
        ),
        compiler_params=pltpu.CompilerParams(dimension_semantics=("parallel",)),
    )(x2d, wq, wk, wv, bq.reshape(1, E), bk.reshape(1, E), bv.reshape(1, E))
    return q[:R], k[:R], v[:R]


# --------------------------------------------------------------------------------------
# Scaled-dot-product attention, one batch element per grid step, heads batched inside
# --------------------------------------------------------------------------------------
def _mha_kernel(q_ref, k_ref, v_ref, o_ref, *, scale):
    q = q_ref[0].astype(jnp.float32)                        # (H, S, Dh)
    k = k_ref[0].astype(jnp.float32)                        # (H, S, Dh)
    v = v_ref[0]                                            # (H, S, Dh)
    s = jnp.einsum("hqd,hkd->hqk", q, k,
                   preferred_element_type=jnp.float32) * scale
    m = jnp.max(s, axis=-1, keepdims=True)
    p = jnp.exp(s - m)
    p = p / jnp.sum(p, axis=-1, keepdims=True)
    o = jnp.einsum("hqk,hkd->hqd", p.astype(v.dtype), v,
                   preferred_element_type=jnp.float32)
    o_ref[0] = o.astype(o_ref.dtype)


def mha_attention(q, k, v, *, scale):
    """q/k/v: (B, H, S, Dh)."""
    B, H, S, Dh = q.shape
    blk = pl.BlockSpec((1, H, S, Dh), lambda i: (i, 0, 0, 0))
    return pl.pallas_call(
        functools.partial(_mha_kernel, scale=scale),
        out_shape=jax.ShapeDtypeStruct((B, H, S, Dh), q.dtype),
        grid_spec=pl.GridSpec(
            grid=(B,),
            in_specs=[blk, blk, blk],
            out_specs=blk,
        ),
        compiler_params=pltpu.CompilerParams(dimension_semantics=("parallel",)),
    )(q, k, v)


# --------------------------------------------------------------------------------------
# Attention output projection fused with residual add + LayerNorm
#   out = LN(res + (o @ Wo + bo))
# --------------------------------------------------------------------------------------
def _proj_add_ln_kernel(x_ref, w_ref, b_ref, r_ref, g_ref, bb_ref, o_ref, *, eps):
    acc = jnp.dot(x_ref[...], w_ref[...], preferred_element_type=jnp.float32)
    y = acc + b_ref[...].astype(jnp.float32) + r_ref[...].astype(jnp.float32)
    mean = jnp.mean(y, axis=-1, keepdims=True)
    yc = y - mean
    var = jnp.mean(yc * yc, axis=-1, keepdims=True)
    inv = jax.lax.rsqrt(var + eps)
    o_ref[...] = (yc * inv * g_ref[...].astype(jnp.float32)
                  + bb_ref[...].astype(jnp.float32)).astype(o_ref.dtype)


def proj_add_layernorm(o2d, w, b, res2d, gamma, beta, *, eps=1e-5, tile_rows=256):
    R, E = o2d.shape
    tm = min(tile_rows, _round_up(R, 8))
    o2d, r_pad = _pad_rows(o2d, tm)
    res2d, _ = _pad_rows(res2d, tm)
    out = pl.pallas_call(
        functools.partial(_proj_add_ln_kernel, eps=eps),
        out_shape=jax.ShapeDtypeStruct((r_pad, E), o2d.dtype),
        grid_spec=pl.GridSpec(
            grid=(r_pad // tm,),
            in_specs=[
                pl.BlockSpec((tm, E), lambda i: (i, 0)),
                pl.BlockSpec((E, E), lambda i: (0, 0)),
                pl.BlockSpec((1, E), lambda i: (0, 0)),
                pl.BlockSpec((tm, E), lambda i: (i, 0)),
                pl.BlockSpec((1, E), lambda i: (0, 0)),
                pl.BlockSpec((1, E), lambda i: (0, 0)),
            ],
            out_specs=pl.BlockSpec((tm, E), lambda i: (i, 0)),
        ),
        compiler_params=pltpu.CompilerParams(dimension_semantics=("parallel",)),
    )(o2d, w, b.reshape(1, E), res2d, gamma.reshape(1, E), beta.reshape(1, E))
    return out[:R]


# --------------------------------------------------------------------------------------
# Full FFN fused with residual add + LayerNorm:
#   out = LN(x + (relu(x @ W1 + b1) @ W2 + b2))
# --------------------------------------------------------------------------------------
def _ffn_add_ln_kernel(x_ref, w1_ref, b1_ref, w2_ref, b2_ref, g_ref, bb_ref, o_ref, *, eps):
    x = x_ref[...]
    h = jnp.dot(x, w1_ref[...], preferred_element_type=jnp.float32)
    h = jnp.maximum(h + b1_ref[...].astype(jnp.float32), 0.0)
    ff = jnp.dot(h.astype(x.dtype), w2_ref[...], preferred_element_type=jnp.float32)
    y = ff + b2_ref[...].astype(jnp.float32) + x.astype(jnp.float32)
    mean = jnp.mean(y, axis=-1, keepdims=True)
    yc = y - mean
    var = jnp.mean(yc * yc, axis=-1, keepdims=True)
    inv = jax.lax.rsqrt(var + eps)
    o_ref[...] = (yc * inv * g_ref[...].astype(jnp.float32)
                  + bb_ref[...].astype(jnp.float32)).astype(o_ref.dtype)


def ffn_add_layernorm(x2d, w1, b1, w2, b2, gamma, beta, *, eps=1e-5, tile_rows=256):
    R, E = x2d.shape
    F = w1.shape[1]
    tm = min(tile_rows, _round_up(R, 8))
    x2d, r_pad = _pad_rows(x2d, tm)
    out = pl.pallas_call(
        functools.partial(_ffn_add_ln_kernel, eps=eps),
        out_shape=jax.ShapeDtypeStruct((r_pad, E), x2d.dtype),
        grid_spec=pl.GridSpec(
            grid=(r_pad // tm,),
            in_specs=[
                pl.BlockSpec((tm, E), lambda i: (i, 0)),
                pl.BlockSpec((E, F), lambda i: (0, 0)),
                pl.BlockSpec((1, F), lambda i: (0, 0)),
                pl.BlockSpec((F, E), lambda i: (0, 0)),
                pl.BlockSpec((1, E), lambda i: (0, 0)),
                pl.BlockSpec((1, E), lambda i: (0, 0)),
                pl.BlockSpec((1, E), lambda i: (0, 0)),
            ],
            out_specs=pl.BlockSpec((tm, E), lambda i: (i, 0)),
        ),
        compiler_params=pltpu.CompilerParams(dimension_semantics=("parallel",)),
    )(x2d, w1, b1.reshape(1, F), w2, b2.reshape(1, E),
      gamma.reshape(1, E), beta.reshape(1, E))
    return out[:R]


# --------------------------------------------------------------------------------------
# Output head: linear -> ReLU -> linear fused (dropout is identity in eval mode)
# --------------------------------------------------------------------------------------
def _mlp_kernel(x_ref, w1_ref, b1_ref, w2_ref, b2_ref, o_ref):
    x = x_ref[...]
    h = jnp.dot(x, w1_ref[...], preferred_element_type=jnp.float32)
    h = jnp.maximum(h + b1_ref[...].astype(jnp.float32), 0.0)
    o = jnp.dot(h.astype(x.dtype), w2_ref[...], preferred_element_type=jnp.float32)
    o_ref[...] = (o + b2_ref[...].astype(jnp.float32)).astype(o_ref.dtype)


def mlp_head(x2d, w1, b1, w2, b2, *, tile_rows=256):
    R, K = x2d.shape
    Hm = w1.shape[1]
    N = w2.shape[1]
    tm = min(tile_rows, _round_up(R, 8))
    x2d, r_pad = _pad_rows(x2d, tm)
    out = pl.pallas_call(
        _mlp_kernel,
        out_shape=jax.ShapeDtypeStruct((r_pad, N), x2d.dtype),
        grid_spec=pl.GridSpec(
            grid=(r_pad // tm,),
            in_specs=[
                pl.BlockSpec((tm, K), lambda i: (i, 0)),
                pl.BlockSpec((K, Hm), lambda i: (0, 0)),
                pl.BlockSpec((1, Hm), lambda i: (0, 0)),
                pl.BlockSpec((Hm, N), lambda i: (0, 0)),
                pl.BlockSpec((1, N), lambda i: (0, 0)),
            ],
            out_specs=pl.BlockSpec((tm, N), lambda i: (i, 0)),
        ),
        compiler_params=pltpu.CompilerParams(dimension_semantics=("parallel",)),
    )(x2d, w1, b1.reshape(1, Hm), w2, b2.reshape(1, N))
    return out[:R]


# --------------------------------------------------------------------------------------
# LSTM layer: parallel input-gate precompute (big MXU matmul over all timesteps),
# then a sequential recurrence kernel (grid over time, h/c in VMEM scratch).
# --------------------------------------------------------------------------------------
def _lstm_recurrent_kernel(gx_ref, whh_ref, o_ref, h_scr, c_scr):
    t = pl.program_id(0)

    @pl.when(t == 0)
    def _():
        h_scr[...] = jnp.zeros_like(h_scr)
        c_scr[...] = jnp.zeros_like(c_scr)

    H = h_scr.shape[-1]
    gates = (gx_ref[0].astype(jnp.float32)
             + jnp.dot(h_scr[...], whh_ref[...],
                       preferred_element_type=jnp.float32))   # (B, 4H), gate order i,f,g,o
    i_g = jax.nn.sigmoid(gates[:, 0 * H:1 * H])
    f_g = jax.nn.sigmoid(gates[:, 1 * H:2 * H])
    g_g = jnp.tanh(gates[:, 2 * H:3 * H])
    o_g = jax.nn.sigmoid(gates[:, 3 * H:4 * H])
    c_new = f_g * c_scr[...] + i_g * g_g
    h_new = o_g * jnp.tanh(c_new)
    c_scr[...] = c_new
    h_scr[...] = h_new
    o_ref[0] = h_new.astype(o_ref.dtype)


def lstm_layer(x, wih, whh, b):
    """x: (B, S, Din); wih: (Din, 4H); whh: (H, 4H); b: (4H,).  Returns (B, S, H)."""
    B, S, Din = x.shape
    H = whh.shape[0]
    # Parallel part of the gates for every timestep at once (row-parallel MXU matmul).
    gx = linear(x.reshape(B * S, Din), wih, b)                 # (B*S, 4H)
    gx = gx.reshape(B, S, 4 * H).transpose(1, 0, 2)            # (S, B, 4H), time-major
    out = pl.pallas_call(
        _lstm_recurrent_kernel,
        out_shape=jax.ShapeDtypeStruct((S, B, H), x.dtype),
        grid_spec=pl.GridSpec(
            grid=(S,),
            in_specs=[
                pl.BlockSpec((1, B, 4 * H), lambda t: (t, 0, 0)),
                pl.BlockSpec((H, 4 * H), lambda t: (0, 0)),
            ],
            out_specs=pl.BlockSpec((1, B, H), lambda t: (t, 0, 0)),
            scratch_shapes=[
                pltpu.VMEM((B, H), jnp.float32),               # h_{t-1}
                pltpu.VMEM((B, H), jnp.float32),               # c_{t-1}
            ],
        ),
        compiler_params=pltpu.CompilerParams(dimension_semantics=("arbitrary",)),
    )(gx, whh)
    return jnp.transpose(out, (1, 0, 2))


# --------------------------------------------------------------------------------------
# Model composition (glue reshapes/transposes in plain JAX; compute in Pallas kernels)
# --------------------------------------------------------------------------------------
def multi_head_attention(x, p, nhead):
    """Returns the pre-out-projection attention output, shape (B*S, E)."""
    B, S, E = x.shape
    Dh = E // nhead
    x2d = x.reshape(B * S, E)
    q, k, v = qkv_projection(x2d, p["wq"], p["wk"], p["wv"], p["bq"], p["bk"], p["bv"])

    def split_heads(t):
        return t.reshape(B, S, nhead, Dh).transpose(0, 2, 1, 3)   # (B, H, S, Dh)

    oh = mha_attention(split_heads(q), split_heads(k), split_heads(v),
                       scale=1.0 / float(np.sqrt(Dh)))
    return oh.transpose(0, 2, 1, 3).reshape(B * S, E)


def transformer_encoder_layer(x, p, nhead):
    """Post-norm TransformerEncoderLayer (PyTorch default), ReLU FFN, eval mode."""
    B, S, E = x.shape
    o2d = multi_head_attention(x, p, nhead)                    # (B*S, E), pre-out-proj
    # out-projection + residual + LayerNorm fused
    x2d = proj_add_layernorm(o2d, p["wo"], p["bo"], x.reshape(B * S, E),
                             p["ln1_g"], p["ln1_b"])
    # FFN + residual + LayerNorm fused
    x2d = ffn_add_layernorm(x2d, p["w1"], p["b1"], p["w2"], p["b2"],
                            p["ln2_g"], p["ln2_b"])
    return x2d.reshape(B, S, E)


def hybrid_lstm_transformer_forward(params, x, *, nhead):
    B, S, _ = x.shape

    # LSTM branch (inter-layer dropout is identity in eval mode)
    h = x
    for (wih, whh, b) in params["lstm"]:
        h = lstm_layer(h, wih, whh, b)
    lstm_out = h                                                # (B, S, lstm_hidden)

    # Transformer branch — PE add fused into the input-projection matmul
    pe = params["pe"][:S].astype(x.dtype)                       # cast once, in the wrapper
    t = input_projection_with_pe(x, params["wp"], params["bp"], pe)
    for lp in params["layers"]:
        t = transformer_encoder_layer(t, lp, nhead)

    # Output head on concatenated features (linear -> ReLU -> linear fused)
    comb = jnp.concatenate([lstm_out, t], axis=-1)              # (B, S, lstm_h + transf_h)
    Hc = comb.shape[-1]
    # TODO(synk): nn.Dropout inside the output head is a no-op in eval mode; omitted.
    y = mlp_head(comb.reshape(B * S, Hc), params["w_out1"], params["b_out1"],
                 params["w_out2"], params["b_out2"])
    return y.reshape(B, S, -1)


# --------------------------------------------------------------------------------------
# Parameter init (Xavier-uniform weights, zero biases, ones LN gamma — same scheme as
# the PyTorch _init_weights; weights regenerated with JAX PRNG).
# --------------------------------------------------------------------------------------
def init_params(key, *, input_size, hidden_size, output_size,
                num_lstm_layers, num_transformer_layers, lstm_ratio, max_len=5000):
    lstm_hidden = int(hidden_size * lstm_ratio)
    transformer_hidden = hidden_size - lstm_hidden

    def xavier(k, shape):
        lim = float(np.sqrt(6.0 / (shape[0] + shape[1])))
        return jax.random.uniform(k, shape, jnp.float32, -lim, lim)

    keys = iter(jax.random.split(key, 64))
    params = {}

    lstm = []
    d_in = input_size
    for _ in range(num_lstm_layers):
        wih = xavier(next(keys), (d_in, 4 * lstm_hidden))
        whh = xavier(next(keys), (lstm_hidden, 4 * lstm_hidden))
        b = jnp.zeros((4 * lstm_hidden,), jnp.float32)
        lstm.append((wih, whh, b))
        d_in = lstm_hidden
    params["lstm"] = lstm

    params["wp"] = xavier(next(keys), (input_size, transformer_hidden))
    params["bp"] = jnp.zeros((transformer_hidden,), jnp.float32)
    params["pe"] = make_positional_encoding(transformer_hidden, max_len)

    ffn = transformer_hidden * 4
    layers = []
    for _ in range(num_transformer_layers):
        layers.append({
            "wq": xavier(next(keys), (transformer_hidden, transformer_hidden)),
            "wk": xavier(next(keys), (transformer_hidden, transformer_hidden)),
            "wv": xavier(next(keys), (transformer_hidden, transformer_hidden)),
            "wo": xavier(next(keys), (transformer_hidden, transformer_hidden)),
            "bq": jnp.zeros((transformer_hidden,), jnp.float32),
            "bk": jnp.zeros((transformer_hidden,), jnp.float32),
            "bv": jnp.zeros((transformer_hidden,), jnp.float32),
            "bo": jnp.zeros((transformer_hidden,), jnp.float32),
            "ln1_g": jnp.ones((transformer_hidden,), jnp.float32),
            "ln1_b": jnp.zeros((transformer_hidden,), jnp.float32),
            "w1": xavier(next(keys), (transformer_hidden, ffn)),
            "b1": jnp.zeros((ffn,), jnp.float32),
            "w2": xavier(next(keys), (ffn, transformer_hidden)),
            "b2": jnp.zeros((transformer_hidden,), jnp.float32),
            "ln2_g": jnp.ones((transformer_hidden,), jnp.float32),
            "ln2_b": jnp.zeros((transformer_hidden,), jnp.float32),
        })
    params["layers"] = layers

    params["w_out1"] = xavier(next(keys), (lstm_hidden + transformer_hidden, hidden_size))
    params["b_out1"] = jnp.zeros((hidden_size,), jnp.float32)
    params["w_out2"] = xavier(next(keys), (hidden_size, output_size))
    params["b_out2"] = jnp.zeros((output_size,), jnp.float32)
    return params


# --------------------------------------------------------------------------------------
# Pure-JAX reference forward (same math, same weights) for correctness check
# --------------------------------------------------------------------------------------
def _ref_layernorm(x, g, b, eps=1e-5):
    mean = jnp.mean(x, axis=-1, keepdims=True)
    var = jnp.mean((x - mean) ** 2, axis=-1, keepdims=True)
    return (x - mean) * jax.lax.rsqrt(var + eps) * g + b


def ref_forward(params, x, *, nhead):
    B, S, _ = x.shape
    h = x
    for (wih, whh, b) in params["lstm"]:
        H = whh.shape[0]

        def step(carry, xt, wih=wih, whh=whh, b=b, H=H):
            hp, cp = carry
            gates = xt @ wih + hp @ whh + b
            i = jax.nn.sigmoid(gates[:, :H])
            f = jax.nn.sigmoid(gates[:, H:2 * H])
            g = jnp.tanh(gates[:, 2 * H:3 * H])
            o = jax.nn.sigmoid(gates[:, 3 * H:])
            c = f * cp + i * g
            hn = o * jnp.tanh(c)
            return (hn, c), hn

        xs = jnp.transpose(h, (1, 0, 2))
        init = (jnp.zeros((B, H), x.dtype), jnp.zeros((B, H), x.dtype))
        _, ys = jax.lax.scan(step, init, xs)
        h = jnp.transpose(ys, (1, 0, 2))
    lstm_out = h

    t = x @ params["wp"] + params["bp"] + params["pe"][:S][None]
    E = t.shape[-1]
    Dh = E // nhead
    for p in params["layers"]:
        q = (t @ p["wq"] + p["bq"]).reshape(B, S, nhead, Dh).transpose(0, 2, 1, 3)
        k = (t @ p["wk"] + p["bk"]).reshape(B, S, nhead, Dh).transpose(0, 2, 1, 3)
        v = (t @ p["wv"] + p["bv"]).reshape(B, S, nhead, Dh).transpose(0, 2, 1, 3)
        s = jnp.einsum("bhqd,bhkd->bhqk", q, k) / np.sqrt(Dh)
        a = jax.nn.softmax(s, axis=-1)
        o = jnp.einsum("bhqk,bhkd->bhqd", a, v).transpose(0, 2, 1, 3).reshape(B, S, E)
        attn = o @ p["wo"] + p["bo"]
        t = _ref_layernorm(t + attn, p["ln1_g"], p["ln1_b"])
        ff = jax.nn.relu(t @ p["w1"] + p["b1"]) @ p["w2"] + p["b2"]
        t = _ref_layernorm(t + ff, p["ln2_g"], p["ln2_b"])

    comb = jnp.concatenate([lstm_out, t], axis=-1)
    y = jax.nn.relu(comb @ params["w_out1"] + params["b_out1"])
    y = y @ params["w_out2"] + params["b_out2"]
    return y


if __name__ == "__main__":
    # Small shapes consistent with the module's forward: x is [batch, seq_len, features]
    batch, seq_len = 2, 8
    input_size, hidden_size, output_size = 16, 64, 8
    num_lstm_layers, num_transformer_layers = 2, 2
    nhead, lstm_ratio = 4, 0.5      # -> lstm_hidden=32, transformer_hidden=32, head_dim=8

    root = jax.random.PRNGKey(0)
    k_x, k_p = jax.random.split(root)
    x = jax.random.normal(k_x, (batch, seq_len, input_size), dtype=jnp.float32)
    params = init_params(k_p, input_size=input_size, hidden_size=hidden_size,
                         output_size=output_size, num_lstm_layers=num_lstm_layers,
                         num_transformer_layers=num_transformer_layers,
                         lstm_ratio=lstm_ratio)

    fwd = jax.jit(functools.partial(hybrid_lstm_transformer_forward, nhead=nhead))
    out = jax.block_until_ready(fwd(params, x))

    ref = jax.block_until_ready(ref_forward(params, x, nhead=nhead))

    assert out.shape == (batch, seq_len, output_size), out.shape
    assert out.dtype == x.dtype
    # Tolerance covers MXU-vs-XLA f32 matmul precision differences.
    max_err = float(jnp.max(jnp.abs(out - ref)))
    assert jnp.allclose(out, ref, atol=2e-2, rtol=2e-2), f"mismatch vs reference, max abs err={max_err}"

    print("KERNEL_OK")
</pallas_src>

<mosaic_0001>
module attributes {stable_mosaic.version = 11 : i64} {
  func.func @_proj_pe_kernel(%arg0: i32, %arg1: memref<1x8x16xf32, #tpu.memory_space<vmem>>, %arg2: memref<16x32xf32, #tpu.memory_space<vmem>>, %arg3: memref<1x32xf32, #tpu.memory_space<vmem>>, %arg4: memref<8x32xf32, #tpu.memory_space<vmem>>, %arg5: memref<1x8x32xf32, #tpu.memory_space<vmem>>) attributes {dimension_semantics = [#tpu.dimension_semantics<parallel>], iteration_bounds = array<i64: 2>, scalar_prefetch = 0 : i64, scratch_operands = 0 : i64, tpu.core_type = #tpu.core_type<tc>, window_params = [{transform_indices = @transform_0, window_bounds = array<i64: 1, 8, 16>}, {pipeline_mode = #tpu.pipeline_mode<synchronous>, transform_indices = @transform_1, window_bounds = array<i64: 16, 32>}, {pipeline_mode = #tpu.pipeline_mode<synchronous>, transform_indices = @transform_2, window_bounds = array<i64: 1, 32>}, {pipeline_mode = #tpu.pipeline_mode<synchronous>, transform_indices = @transform_3, window_bounds = array<i64: 8, 32>}, {transform_indices = @transform_4, window_bounds = array<i64: 1, 8, 32>}]} {
    %c0 = arith.constant 0 : index
    %c0_0 = arith.constant 0 : index
    %c0_1 = arith.constant 0 : index
    %0 = vector.load %arg1[%c0, %c0_0, %c0_1] : memref<1x8x16xf32, #tpu.memory_space<vmem>>, vector<1x8x16xf32>
    %1 = vector.shape_cast %0 : vector<1x8x16xf32> to vector<8x16xf32>
    %c0_2 = arith.constant 0 : index
    %c0_3 = arith.constant 0 : index
    %2 = vector.load %arg2[%c0_2, %c0_3] : memref<16x32xf32, #tpu.memory_space<vmem>>, vector<16x32xf32>
    %cst = arith.constant dense<0.000000e+00> : vector<8x32xf32>
    %3 = tpu.matmul %1, %2, %cst {dimension_numbers = #tpu.dot_dimension_numbers<[1], [0], [0], [1], [0, 0, 1, 1], [], []>} : vector<8x16xf32>, vector<16x32xf32>, vector<8x32xf32> -> vector<8x32xf32>
    %c0_4 = arith.constant 0 : index
    %c0_5 = arith.constant 0 : index
    %4 = vector.load %arg3[%c0_4, %c0_5] : memref<1x32xf32, #tpu.memory_space<vmem>>, vector<1x32xf32>
    %5 = vector.broadcast %4 : vector<1x32xf32> to vector<8x32xf32>
    %6 = arith.addf %3, %5 : vector<8x32xf32>
    %c0_6 = arith.constant 0 : index
    %c0_7 = arith.constant 0 : index
    %7 = vector.load %arg4[%c0_6, %c0_7] : memref<8x32xf32, #tpu.memory_space<vmem>>, vector<8x32xf32>
    %8 = arith.addf %6, %7 : vector<8x32xf32>
    %c0_8 = arith.constant 0 : index
    %c0_9 = arith.constant 0 : index
    %c0_10 = arith.constant 0 : index
    %9 = vector.load %arg5[%c0_8, %c0_9, %c0_10] : memref<1x8x32xf32, #tpu.memory_space<vmem>>, vector<1x8x32xf32>
    %10 = vector.shape_cast %9 : vector<1x8x32xf32> to vector<8x32xf32>
    %11 = vector.shape_cast %8 : vector<8x32xf32> to vector<1x8x32xf32>
    tpu.vector_store %arg5[%c0_8, %c0_9, %c0_10], %11 {strides = array<i32>} : memref<1x8x32xf32, #tpu.memory_space<vmem>>, vector<1x8x32xf32>,
    return
  }
  func.func @transform_0(%arg0: i32) -> (i32, i32, i32) {
    %c0_i32 = arith.constant 0 : i32
    %c0_i32_0 = arith.constant 0 : i32
    %c0_i32_1 = arith.constant 0 : i32
    return %arg0, %c0_i32, %c0_i32_0 : i32, i32, i32
  }
  func.func @transform_1(%arg0: i32) -> (i32, i32) {
    %c0_i32 = arith.constant 0 : i32
    %c0_i32_0 = arith.constant 0 : i32
    %c0_i32_1 = arith.constant 0 : i32
    return %c0_i32, %c0_i32_0 : i32, i32
  }
  func.func @transform_2(%arg0: i32) -> (i32, i32) {
    %c0_i32 = arith.constant 0 : i32
    %c0_i32_0 = arith.constant 0 : i32
    %c0_i32_1 = arith.constant 0 : i32
    return %c0_i32, %c0_i32_0 : i32, i32
  }
  func.func @transform_3(%arg0: i32) -> (i32, i32) {
    %c0_i32 = arith.constant 0 : i32
    %c0_i32_0 = arith.constant 0 : i32
    %c0_i32_1 = arith.constant 0 : i32
    return %c0_i32, %c0_i32_0 : i32, i32
  }
  func.func @transform_4(%arg0: i32) -> (i32, i32, i32) {
    %c0_i32 = arith.constant 0 : i32
    %c0_i32_0 = arith.constant 0 : i32
    %c0_i32_1 = arith.constant 0 : i32
    return %arg0, %c0_i32, %c0_i32_0 : i32, i32, i32
  }
}

module attributes {stable_mosaic.version = 11 : i64} {
  func.func @_qkv_kernel(%arg0: i32, %arg1: memref<16x32xf32, #tpu.memory_space<vmem>>, %arg2: memref<32x32xf32, #tpu.memory_space<vmem>>, %arg3: memref<32x32xf32, #tpu.memory_space<vmem>>, %arg4: memref<32x32xf32, #tpu.memory_space<vmem>>, %arg5: memref<1x32xf32, #tpu.memory_space<vmem>>, %arg6: memref<1x32xf32, #tpu.memory_space<vmem>>, %arg7: memref<1x32xf32, #tpu.memory_space<vmem>>, %arg8: memref<16x32xf32, #tpu.memory_space<vmem>>, %arg9: memref<16x32xf32, #tpu.memory_space<vmem>>, %arg10: memref<16x32xf32, #tpu.memory_space<vmem>>) attributes {dimension_semantics = [#tpu.dimension_semantics<parallel>], iteration_bounds = array<i64: 1>, scalar_prefetch = 0 : i64, scratch_operands = 0 : i64, tpu.core_type = #tpu.core_type<tc>, window_params = [{transform_indices = @transform_0, window_bounds = array<i64: 16, 32>}, {pipeline_mode = #tpu.pipeline_mode<synchronous>, transform_indices = @transform_1, window_bounds = array<i64: 32, 32>}, {pipeline_mode = #tpu.pipeline_mode<synchronous>, transform_indices = @transform_2, window_bounds = array<i64: 32, 32>}, {pipeline_mode = #tpu.pipeline_mode<synchronous>, transform_indices = @transform_3, window_bounds = array<i64: 32, 32>}, {pipeline_mode = #tpu.pipeline_mode<synchronous>, transform_indices = @transform_4, window_bounds = array<i64: 1, 32>}, {pipeline_mode = #tpu.pipeline_mode<synchronous>, transform_indices = @transform_5, window_bounds = array<i64: 1, 32>}, {pipeline_mode = #tpu.pipeline_mode<synchronous>, transform_indices = @transform_6, window_bounds = array<i64: 1, 32>}, {transform_indices = @transform_7, window_bounds = array<i64: 16, 32>}, {transform_indices = @transform_8, window_bounds = array<i64: 16, 32>}, {transform_indices = @transform_9, window_bounds = array<i64: 16, 32>}]} {
    %c0 = arith.constant 0 : index
    %c0_0 = arith.constant 0 : index
    %0 = vector.load %arg1[%c0, %c0_0] : memref<16x32xf32, #tpu.memory_space<vmem>>, vector<16x32xf32>
    %c0_1 = arith.constant 0 : index
    %c0_2 = arith.constant 0 : index
    %1 = vector.load %arg2[%c0_1, %c0_2] : memref<32x32xf32, #tpu.memory_space<vmem>>, vector<32x32xf32>
    %cst = arith.constant dense<0.000000e+00> : vector<16x32xf32>
    %2 = tpu.matmul %0, %1, %cst {dimension_numbers = #tpu.dot_dimension_numbers<[1], [0], [0], [1], [0, 0, 1, 1], [], []>} : vector<16x32xf32>, vector<32x32xf32>, vector<16x32xf32> -> vector<16x32xf32>
    %c0_3 = arith.constant 0 : index
    %c0_4 = arith.constant 0 : index
    %3 = vector.load %arg5[%c0_3, %c0_4] : memref<1x32xf32, #tpu.memory_space<vmem>>, vector<1x32xf32>
    %4 = vector.broadcast %3 : vector<1x32xf32> to vector<16x32xf32>
    %5 = arith.addf %2, %4 : vector<16x32xf32>
    %c0_5 = arith.constant 0 : index
    %c0_6 = arith.constant 0 : index
    %6 = vector.load %arg8[%c0_5, %c0_6] : memref<16x32xf32, #tpu.memory_space<vmem>>, vector<16x32xf32>
    tpu.vector_store %arg8[%c0_5, %c0_6], %5 {strides = array<i32>} : memref<16x32xf32, #tpu.memory_space<vmem>>, vector<16x32xf32>,
    %c0_7 = arith.constant 0 : index
    %c0_8 = arith.constant 0 : index
    %7 = vector.load %arg3[%c0_7, %c0_8] : memref<32x32xf32, #tpu.memory_space<vmem>>, vector<32x32xf32>
    %cst_9 = arith.constant dense<0.000000e+00> : vector<16x32xf32>
    %8 = tpu.matmul %0, %7, %cst_9 {dimension_numbers = #tpu.dot_dimension_numbers<[1], [0], [0], [1], [0, 0, 1, 1], [], []>} : vector<16x32xf32>, vector<32x32xf32>, vector<16x32xf32> -> vector<16x32xf32>
    %c0_10 = arith.constant 0 : index
    %c0_11 = arith.constant 0 : index
    %9 = vector.load %arg6[%c0_10, %c0_11] : memref<1x32xf32, #tpu.memory_space<vmem>>, vector<1x32xf32>
    %10 = vector.broadcast %9 : vector<1x32xf32> to vector<16x32xf32>
    %11 = arith.addf %8, %10 : vector<16x32xf32>
    %c0_12 = arith.constant 0 : index
    %c0_13 = arith.constant 0 : index
    %12 = vector.load %arg9[%c0_12, %c0_13] : memref<16x32xf32, #tpu.memory_space<vmem>>, vector<16x32xf32>
    tpu.vector_store %arg9[%c0_12, %c0_13], %11 {strides = array<i32>} : memref<16x32xf32, #tpu.memory_space<vmem>>, vector<16x32xf32>,
    %c0_14 = arith.constant 0 : index
    %c0_15 = arith.constant 0 : index
    %13 = vector.load %arg4[%c0_14, %c0_15] : memref<32x32xf32, #tpu.memory_space<vmem>>, vector<32x32xf32>
    %cst_16 = arith.constant dense<0.000000e+00> : vector<16x32xf32>
    %14 = tpu.matmul %0, %13, %cst_16 {dimension_numbers = #tpu.dot_dimension_numbers<[1], [0], [0], [1], [0, 0, 1, 1], [], []>} : vector<16x32xf32>, vector<32x32xf32>, vector<16x32xf32> -> vector<16x32xf32>
    %c0_17 = arith.constant 0 : index
    %c0_18 = arith.constant 0 : index
    %15 = vector.load %arg7[%c0_17, %c0_18] : memref<1x32xf32, #tpu.memory_space<vmem>>, vector<1x32xf32>
    %16 = vector.broadcast %15 : vector<1x32xf32> to vector<16x32xf32>
    %17 = arith.addf %14, %16 : vector<16x32xf32>
    %c0_19 = arith.constant 0 : index
    %c0_20 = arith.constant 0 : index
    %18 = vector.load %arg10[%c0_19, %c0_20] : memref<16x32xf32, #tpu.memory_space<vmem>>, vector<16x32xf32>
    tpu.vector_store %arg10[%c0_19, %c0_20], %17 {strides = array<i32>} : memref<16x32xf32, #tpu.memory_space<vmem>>, vector<16x32xf32>,
    return
  }
  func.func @transform_0(%arg0: i32) -> (i32, i32) {
    %c0_i32 = arith.constant 0 : i32
    %c0_i32_0 = arith.constant 0 : i32
    return %arg0, %c0_i32 : i32, i32
  }
  func.func @transform_1(%arg0: i32) -> (i32, i32) {
    %c0_i32 = arith.constant 0 : i32
    %c0_i32_0 = arith.constant 0 : i32
    %c0_i32_1 = arith.constant 0 : i32
    return %c0_i32, %c0_i32_0 : i32, i32
  }
  func.func @transform_2(%arg0: i32) -> (i32, i32) {
    %c0_i32 = arith.constant 0 : i32
    %c0_i32_0 = arith.constant 0 : i32
    %c0_i32_1 = arith.constant 0 : i32
    return %c0_i32, %c0_i32_0 : i32, i32
  }
  func.func @transform_3(%arg0: i32) -> (i32, i32) {
    %c0_i32 = arith.constant 0 : i32
    %c0_i32_0 = arith.constant 0 : i32
    %c0_i32_1 = arith.constant 0 : i32
    return %c0_i32, %c0_i32_0 : i32, i32
  }
  func.func @transform_4(%arg0: i32) -> (i32, i32) {
    %c0_i32 = arith.constant 0 : i32
    %c0_i32_0 = arith.constant 0 : i32
    %c0_i32_1 = arith.constant 0 : i32
    return %c0_i32, %c0_i32_0 : i32, i32
  }
  func.func @transform_5(%arg0: i32) -> (i32, i32) {
    %c0_i32 = arith.constant 0 : i32
    %c0_i32_0 = arith.constant 0 : i32
    %c0_i32_1 = arith.constant 0 : i32
    return %c0_i32, %c0_i32_0 : i32, i32
  }
  func.func @transform_6(%arg0: i32) -> (i32, i32) {
    %c0_i32 = arith.constant 0 : i32
    %c0_i32_0 = arith.constant 0 : i32
    %c0_i32_1 = arith.constant 0 : i32
    return %c0_i32, %c0_i32_0 : i32, i32
  }
  func.func @transform_7(%arg0: i32) -> (i32, i32) {
    %c0_i32 = arith.constant 0 : i32
    %c0_i32_0 = arith.constant 0 : i32
    return %arg0, %c0_i32 : i32, i32
  }
  func.func @transform_8(%arg0: i32) -> (i32, i32) {
    %c0_i32 = arith.constant 0 : i32
    %c0_i32_0 = arith.constant 0 : i32
    return %arg0, %c0_i32 : i32, i32
  }
  func.func @transform_9(%arg0: i32) -> (i32, i32) {
    %c0_i32 = arith.constant 0 : i32
    %c0_i32_0 = arith.constant 0 : i32
    return %arg0, %c0_i32 : i32, i32
  }
}

module attributes {stable_mosaic.version = 11 : i64} {
  func.func @_mha_kernel(%arg0: i32, %arg1: memref<1x4x8x8xf32, #tpu.memory_space<vmem>>, %arg2: memref<1x4x8x8xf32, #tpu.memory_space<vmem>>, %arg3: memref<1x4x8x8xf32, #tpu.memory_space<vmem>>, %arg4: memref<1x4x8x8xf32, #tpu.memory_space<vmem>>) attributes {dimension_semantics = [#tpu.dimension_semantics<parallel>], iteration_bounds = array<i64: 2>, scalar_prefetch = 0 : i64, scratch_operands = 0 : i64, tpu.core_type = #tpu.core_type<tc>, window_params = [{transform_indices = @transform_0, window_bounds = array<i64: 1, 4, 8, 8>}, {transform_indices = @transform_1, window_bounds = array<i64: 1, 4, 8, 8>}, {transform_indices = @transform_2, window_bounds = array<i64: 1, 4, 8, 8>}, {transform_indices = @transform_3, window_bounds = array<i64: 1, 4, 8, 8>}]} {
    %c0 = arith.constant 0 : index
    %c0_0 = arith.constant 0 : index
    %c0_1 = arith.constant 0 : index
    %c0_2 = arith.constant 0 : index
    %0 = vector.load %arg1[%c0, %c0_0, %c0_1, %c0_2] : memref<1x4x8x8xf32, #tpu.memory_space<vmem>>, vector<1x4x8x8xf32>
    %1 = vector.shape_cast %0 : vector<1x4x8x8xf32> to vector<4x8x8xf32>
    %c0_3 = arith.constant 0 : index
    %c0_4 = arith.constant 0 : index
    %c0_5 = arith.constant 0 : index
    %c0_6 = arith.constant 0 : index
    %2 = vector.load %arg2[%c0_3, %c0_4, %c0_5, %c0_6] : memref<1x4x8x8xf32, #tpu.memory_space<vmem>>, vector<1x4x8x8xf32>
    %3 = vector.shape_cast %2 : vector<1x4x8x8xf32> to vector<4x8x8xf32>
    %c0_7 = arith.constant 0 : index
    %c0_8 = arith.constant 0 : index
    %c0_9 = arith.constant 0 : index
    %c0_10 = arith.constant 0 : index
    %4 = vector.load %arg3[%c0_7, %c0_8, %c0_9, %c0_10] : memref<1x4x8x8xf32, #tpu.memory_space<vmem>>, vector<1x4x8x8xf32>
    %5 = vector.shape_cast %4 : vector<1x4x8x8xf32> to vector<4x8x8xf32>
    "tpu.trace_start"() <{level = 10 : i32, message = "hqd,hkd->hqk"}> : () -> ()
    %cst = arith.constant dense<0.000000e+00> : vector<4x8x8xf32>
    %6 = tpu.matmul %1, %3, %cst {dimension_numbers = #tpu.dot_dimension_numbers<[2], [2], [1], [1], [0, 0, 0, 1, 1, 1], [0], [0]>} : vector<4x8x8xf32>, vector<4x8x8xf32>, vector<4x8x8xf32> -> vector<4x8x8xf32>
    "tpu.trace_stop"() : () -> ()
    %cst_11 = arith.constant 0.353553385 : f32
    %7 = vector.broadcast %cst_11 : f32 to vector<4x8x8xf32>
    %8 = arith.mulf %6, %7 : vector<4x8x8xf32>
    %cst_12 = arith.constant dense<0xFF800000> : vector<4x8xf32>
    %9 = vector.multi_reduction <maximumf>, %8, %cst_12 [2] : vector<4x8x8xf32> to vector<4x8xf32>
    %10 = vector.shape_cast %9 : vector<4x8xf32> to vector<4x8x1xf32>
    %11 = vector.broadcast %10 : vector<4x8x1xf32> to vector<4x8x8xf32>
    %12 = arith.subf %8, %11 : vector<4x8x8xf32>
    %13 = math.exp %12 : vector<4x8x8xf32>
    %cst_13 = arith.constant dense<0.000000e+00> : vector<4x8xf32>
    %14 = vector.multi_reduction <add>, %13, %cst_13 [2] : vector<4x8x8xf32> to vector<4x8xf32>
    %15 = vector.shape_cast %14 : vector<4x8xf32> to vector<4x8x1xf32>
    %16 = vector.broadcast %15 : vector<4x8x1xf32> to vector<4x8x8xf32>
    %17 = arith.divf %13, %16 : vector<4x8x8xf32>
    "tpu.trace_start"() <{level = 10 : i32, message = "hqk,hkd->hqd"}> : () -> ()
    %cst_14 = arith.constant dense<0.000000e+00> : vector<4x8x8xf32>
    %18 = tpu.matmul %17, %5, %cst_14 {dimension_numbers = #tpu.dot_dimension_numbers<[2], [1], [1], [2], [0, 0, 0, 1, 1, 2], [0], [0]>} : vector<4x8x8xf32>, vector<4x8x8xf32>, vector<4x8x8xf32> -> vector<4x8x8xf32>
    "tpu.trace_stop"() : () -> ()
    %c0_15 = arith.constant 0 : index
    %c0_16 = arith.constant 0 : index
    %c0_17 = arith.constant 0 : index
    %c0_18 = arith.constant 0 : index
    %19 = vector.load %arg4[%c0_15, %c0_16, %c0_17, %c0_18] : memref<1x4x8x8xf32, #tpu.memory_space<vmem>>, vector<1x4x8x8xf32>
    %20 = vector.shape_cast %19 : vector<1x4x8x8xf32> to vector<4x8x8xf32>
    %21 = vector.shape_cast %18 : vector<4x8x8xf32> to vector<1x4x8x8xf32>
    tpu.vector_store %arg4[%c0_15, %c0_16, %c0_17, %c0_18], %21 {strides = array<i32>} : memref<1x4x8x8xf32, #tpu.memory_space<vmem>>, vector<1x4x8x8xf32>,
    return
  }
  func.func @transform_0(%arg0: i32) -> (i32, i32, i32, i32) {
    %c0_i32 = arith.constant 0 : i32
    %c0_i32_0 = arith.constant 0 : i32
    %c0_i32_1 = arith.constant 0 : i32
    %c0_i32_2 = arith.constant 0 : i32
    return %arg0, %c0_i32, %c0_i32_0, %c0_i32_1 : i32, i32, i32, i32
  }
  func.func @transform_1(%arg0: i32) -> (i32, i32, i32, i32) {
    %c0_i32 = arith.constant 0 : i32
    %c0_i32_0 = arith.constant 0 : i32
    %c0_i32_1 = arith.constant 0 : i32
    %c0_i32_2 = arith.constant 0 : i32
    return %arg0, %c0_i32, %c0_i32_0, %c0_i32_1 : i32, i32, i32, i32
  }
  func.func @transform_2(%arg0: i32) -> (i32, i32, i32, i32) {
    %c0_i32 = arith.constant 0 : i32
    %c0_i32_0 = arith.constant 0 : i32
    %c0_i32_1 = arith.constant 0 : i32
    %c0_i32_2 = arith.constant 0 : i32
    return %arg0, %c0_i32, %c0_i32_0, %c0_i32_1 : i32, i32, i32, i32
  }
  func.func @transform_3(%arg0: i32) -> (i32, i32, i32, i32) {
    %c0_i32 = arith.constant 0 : i32
    %c0_i32_0 = arith.constant 0 : i32
    %c0_i32_1 = arith.constant 0 : i32
    %c0_i32_2 = arith.constant 0 : i32
    return %arg0, %c0_i32, %c0_i32_0, %c0_i32_1 : i32, i32, i32, i32
  }
}

module attributes {stable_mosaic.version = 11 : i64} {
  func.func @_proj_add_ln_kernel(%arg0: i32, %arg1: memref<16x32xf32, #tpu.memory_space<vmem>>, %arg2: memref<32x32xf32, #tpu.memory_space<vmem>>, %arg3: memref<1x32xf32, #tpu.memory_space<vmem>>, %arg4: memref<16x32xf32, #tpu.memory_space<vmem>>, %arg5: memref<1x32xf32, #tpu.memory_space<vmem>>, %arg6: memref<1x32xf32, #tpu.memory_space<vmem>>, %arg7: memref<16x32xf32, #tpu.memory_space<vmem>>) attributes {dimension_semantics = [#tpu.dimension_semantics<parallel>], iteration_bounds = array<i64: 1>, scalar_prefetch = 0 : i64, scratch_operands = 0 : i64, tpu.core_type = #tpu.core_type<tc>, window_params = [{transform_indices = @transform_0, window_bounds = array<i64: 16, 32>}, {pipeline_mode = #tpu.pipeline_mode<synchronous>, transform_indices = @transform_1, window_bounds = array<i64: 32, 32>}, {pipeline_mode = #tpu.pipeline_mode<synchronous>, transform_indices = @transform_2, window_bounds = array<i64: 1, 32>}, {transform_indices = @transform_3, window_bounds = array<i64: 16, 32>}, {pipeline_mode = #tpu.pipeline_mode<synchronous>, transform_indices = @transform_4, window_bounds = array<i64: 1, 32>}, {pipeline_mode = #tpu.pipeline_mode<synchronous>, transform_indices = @transform_5, window_bounds = array<i64: 1, 32>}, {transform_indices = @transform_6, window_bounds = array<i64: 16, 32>}]} {
    %c0 = arith.constant 0 : index
    %c0_0 = arith.constant 0 : index
    %0 = vector.load %arg1[%c0, %c0_0] : memref<16x32xf32, #tpu.memory_space<vmem>>, vector<16x32xf32>
    %c0_1 = arith.constant 0 : index
    %c0_2 = arith.constant 0 : index
    %1 = vector.load %arg2[%c0_1, %c0_2] : memref<32x32xf32, #tpu.memory_space<vmem>>, vector<32x32xf32>
    %cst = arith.constant dense<0.000000e+00> : vector<16x32xf32>
    %2 = tpu.matmul %0, %1, %cst {dimension_numbers = #tpu.dot_dimension_numbers<[1], [0], [0], [1], [0, 0, 1, 1], [], []>} : vector<16x32xf32>, vector<32x32xf32>, vector<16x32xf32> -> vector<16x32xf32>
    %c0_3 = arith.constant 0 : index
    %c0_4 = arith.constant 0 : index
    %3 = vector.load %arg3[%c0_3, %c0_4] : memref<1x32xf32, #tpu.memory_space<vmem>>, vector<1x32xf32>
    %4 = vector.broadcast %3 : vector<1x32xf32> to vector<16x32xf32>
    %5 = arith.addf %2, %4 : vector<16x32xf32>
    %c0_5 = arith.constant 0 : index
    %c0_6 = arith.constant 0 : index
    %6 = vector.load %arg4[%c0_5, %c0_6] : memref<16x32xf32, #tpu.memory_space<vmem>>, vector<16x32xf32>
    %7 = arith.addf %5, %6 : vector<16x32xf32>
    %cst_7 = arith.constant dense<0.000000e+00> : vector<16xf32>
    %8 = vector.multi_reduction <add>, %7, %cst_7 [1] : vector<16x32xf32> to vector<16xf32>
    %9 = vector.shape_cast %8 : vector<16xf32> to vector<16x1xf32>
    %cst_8 = arith.constant 3.200000e+01 : f32
    %10 = vector.broadcast %cst_8 : f32 to vector<16x1xf32>
    %11 = arith.divf %9, %10 : vector<16x1xf32>
    %12 = vector.broadcast %11 : vector<16x1xf32> to vector<16x32xf32>
    %13 = arith.subf %7, %12 : vector<16x32xf32>
    %14 = arith.mulf %13, %13 : vector<16x32xf32>
    %cst_9 = arith.constant dense<0.000000e+00> : vector<16xf32>
    %15 = vector.multi_reduction <add>, %14, %cst_9 [1] : vector<16x32xf32> to vector<16xf32>
    %16 = vector.shape_cast %15 : vector<16xf32> to vector<16x1xf32>
    %cst_10 = arith.constant 3.200000e+01 : f32
    %17 = vector.broadcast %cst_10 : f32 to vector<16x1xf32>
    %18 = arith.divf %16, %17 : vector<16x1xf32>
    %cst_11 = arith.constant 9.99999974E-6 : f32
    %19 = vector.broadcast %cst_11 : f32 to vector<16x1xf32>
    %20 = arith.addf %18, %19 : vector<16x1xf32>
    %21 = math.rsqrt %20 : vector<16x1xf32>
    %22 = vector.broadcast %21 : vector<16x1xf32> to vector<16x32xf32>
    %23 = arith.mulf %13, %22 : vector<16x32xf32>
    %c0_12 = arith.constant 0 : index
    %c0_13 = arith.constant 0 : index
    %24 = vector.load %arg5[%c0_12, %c0_13] : memref<1x32xf32, #tpu.memory_space<vmem>>, vector<1x32xf32>
    %25 = vector.broadcast %24 : vector<1x32xf32> to vector<16x32xf32>
    %26 = arith.mulf %23, %25 : vector<16x32xf32>
    %c0_14 = arith.constant 0 : index
    %c0_15 = arith.constant 0 : index
    %27 = vector.load %arg6[%c0_14, %c0_15] : memref<1x32xf32, #tpu.memory_space<vmem>>, vector<1x32xf32>
    %28 = vector.broadcast %27 : vector<1x32xf32> to vector<16x32xf32>
    %29 = arith.addf %26, %28 : vector<16x32xf32>
    %c0_16 = arith.constant 0 : index
    %c0_17 = arith.constant 0 : index
    %30 = vector.load %arg7[%c0_16, %c0_17] : memref<16x32xf32, #tpu.memory_space<vmem>>, vector<16x32xf32>
    tpu.vector_store %arg7[%c0_16, %c0_17], %29 {strides = array<i32>} : memref<16x32xf32, #tpu.memory_space<vmem>>, vector<16x32xf32>,
    return
  }
  func.func @transform_0(%arg0: i32) -> (i32, i32) {
    %c0_i32 = arith.constant 0 : i32
    %c0_i32_0 = arith.constant 0 : i32
    return %arg0, %c0_i32 : i32, i32
  }
  func.func @transform_1(%arg0: i32) -> (i32, i32) {
    %c0_i32 = arith.constant 0 : i32
    %c0_i32_0 = arith.constant 0 : i32
    %c0_i32_1 = arith.constant 0 : i32
    return %c0_i32, %c0_i32_0 : i32, i32
  }
  func.func @transform_2(%arg0: i32) -> (i32, i32) {
    %c0_i32 = arith.constant 0 : i32
    %c0_i32_0 = arith.constant 0 : i32
    %c0_i32_1 = arith.constant 0 : i32
    return %c0_i32, %c0_i32_0 : i32, i32
  }
  func.func @transform_3(%arg0: i32) -> (i32, i32) {
    %c0_i32 = arith.constant 0 : i32
    %c0_i32_0 = arith.constant 0 : i32
    return %arg0, %c0_i32 : i32, i32
  }
  func.func @transform_4(%arg0: i32) -> (i32, i32) {
    %c0_i32 = arith.constant 0 : i32
    %c0_i32_0 = arith.constant 0 : i32
    %c0_i32_1 = arith.constant 0 : i32
    return %c0_i32, %c0_i32_0 : i32, i32
  }
  func.func @transform_5(%arg0: i32) -> (i32, i32) {
    %c0_i32 = arith.constant 0 : i32
    %c0_i32_0 = arith.constant 0 : i32
    %c0_i32_1 = arith.constant 0 : i32
    return %c0_i32, %c0_i32_0 : i32, i32
  }
  func.func @transform_6(%arg0: i32) -> (i32, i32) {
    %c0_i32 = arith.constant 0 : i32
    %c0_i32_0 = arith.constant 0 : i32
    return %arg0, %c0_i32 : i32, i32
  }
}

module attributes {stable_mosaic.version = 11 : i64} {
  func.func @_linear_kernel(%arg0: i32, %arg1: memref<16x16xf32, #tpu.memory_space<vmem>>, %arg2: memref<16x128xf32, #tpu.memory_space<vmem>>, %arg3: memref<1x128xf32, #tpu.memory_space<vmem>>, %arg4: memref<16x128xf32, #tpu.memory_space<vmem>>) attributes {dimension_semantics = [#tpu.dimension_semantics<parallel>], iteration_bounds = array<i64: 1>, scalar_prefetch = 0 : i64, scratch_operands = 0 : i64, tpu.core_type = #tpu.core_type<tc>, window_params = [{transform_indices = @transform_0, window_bounds = array<i64: 16, 16>}, {pipeline_mode = #tpu.pipeline_mode<synchronous>, transform_indices = @transform_1, window_bounds = array<i64: 16, 128>}, {pipeline_mode = #tpu.pipeline_mode<synchronous>, transform_indices = @transform_2, window_bounds = array<i64: 1, 128>}, {transform_indices = @transform_3, window_bounds = array<i64: 16, 128>}]} {
    %c0 = arith.constant 0 : index
    %c0_0 = arith.constant 0 : index
    %0 = vector.load %arg1[%c0, %c0_0] : memref<16x16xf32, #tpu.memory_space<vmem>>, vector<16x16xf32>
    %c0_1 = arith.constant 0 : index
    %c0_2 = arith.constant 0 : index
    %1 = vector.load %arg2[%c0_1, %c0_2] : memref<16x128xf32, #tpu.memory_space<vmem>>, vector<16x128xf32>
    %cst = arith.constant dense<0.000000e+00> : vector<16x128xf32>
    %2 = tpu.matmul %0, %1, %cst {dimension_numbers = #tpu.dot_dimension_numbers<[1], [0], [0], [1], [0, 0, 1, 1], [], []>} : vector<16x16xf32>, vector<16x128xf32>, vector<16x128xf32> -> vector<16x128xf32>
    %c0_3 = arith.constant 0 : index
    %c0_4 = arith.constant 0 : index
    %3 = vector.load %arg3[%c0_3, %c0_4] : memref<1x128xf32, #tpu.memory_space<vmem>>, vector<1x128xf32>
    %4 = vector.broadcast %3 : vector<1x128xf32> to vector<16x128xf32>
    %5 = arith.addf %2, %4 : vector<16x128xf32>
    %c0_5 = arith.constant 0 : index
    %c0_6 = arith.constant 0 : index
    %6 = vector.load %arg4[%c0_5, %c0_6] : memref<16x128xf32, #tpu.memory_space<vmem>>, vector<16x128xf32>
    tpu.vector_store %arg4[%c0_5, %c0_6], %5 {strides = array<i32>} : memref<16x128xf32, #tpu.memory_space<vmem>>, vector<16x128xf32>,
    return
  }
  func.func @transform_0(%arg0: i32) -> (i32, i32) {
    %c0_i32 = arith.constant 0 : i32
    %c0_i32_0 = arith.constant 0 : i32
    return %arg0, %c0_i32 : i32, i32
  }
  func.func @transform_1(%arg0: i32) -> (i32, i32) {
    %c0_i32 = arith.constant 0 : i32
    %c0_i32_0 = arith.constant 0 : i32
    %c0_i32_1 = arith.constant 0 : i32
    return %c0_i32, %c0_i32_0 : i32, i32
  }
  func.func @transform_2(%arg0: i32) -> (i32, i32) {
    %c0_i32 = arith.constant 0 : i32
    %c0_i32_0 = arith.constant 0 : i32
    %c0_i32_1 = arith.constant 0 : i32
    return %c0_i32, %c0_i32_0 : i32, i32
  }
  func.func @transform_3(%arg0: i32) -> (i32, i32) {
    %c0_i32 = arith.constant 0 : i32
    %c0_i32_0 = arith.constant 0 : i32
    return %arg0, %c0_i32 : i32, i32
  }
}

module attributes {stable_mosaic.version = 11 : i64} {
  func.func @_ffn_add_ln_kernel(%arg0: i32, %arg1: memref<16x32xf32, #tpu.memory_space<vmem>>, %arg2: memref<32x128xf32, #tpu.memory_space<vmem>>, %arg3: memref<1x128xf32, #tpu.memory_space<vmem>>, %arg4: memref<128x32xf32, #tpu.memory_space<vmem>>, %arg5: memref<1x32xf32, #tpu.memory_space<vmem>>, %arg6: memref<1x32xf32, #tpu.memory_space<vmem>>, %arg7: memref<1x32xf32, #tpu.memory_space<vmem>>, %arg8: memref<16x32xf32, #tpu.memory_space<vmem>>) attributes {dimension_semantics = [#tpu.dimension_semantics<parallel>], iteration_bounds = array<i64: 1>, scalar_prefetch = 0 : i64, scratch_operands = 0 : i64, tpu.core_type = #tpu.core_type<tc>, window_params = [{transform_indices = @transform_0, window_bounds = array<i64: 16, 32>}, {pipeline_mode = #tpu.pipeline_mode<synchronous>, transform_indices = @transform_1, window_bounds = array<i64: 32, 128>}, {pipeline_mode = #tpu.pipeline_mode<synchronous>, transform_indices = @transform_2, window_bounds = array<i64: 1, 128>}, {pipeline_mode = #tpu.pipeline_mode<synchronous>, transform_indices = @transform_3, window_bounds = array<i64: 128, 32>}, {pipeline_mode = #tpu.pipeline_mode<synchronous>, transform_indices = @transform_4, window_bounds = array<i64: 1, 32>}, {pipeline_mode = #tpu.pipeline_mode<synchronous>, transform_indices = @transform_5, window_bounds = array<i64: 1, 32>}, {pipeline_mode = #tpu.pipeline_mode<synchronous>, transform_indices = @transform_6, window_bounds = array<i64: 1, 32>}, {transform_indices = @transform_7, window_bounds = array<i64: 16, 32>}]} {
    %c0 = arith.constant 0 : index
    %c0_0 = arith.constant 0 : index
    %0 = vector.load %arg1[%c0, %c0_0] : memref<16x32xf32, #tpu.memory_space<vmem>>, vector<16x32xf32>
    %c0_1 = arith.constant 0 : index
    %c0_2 = arith.constant 0 : index
    %1 = vector.load %arg2[%c0_1, %c0_2] : memref<32x128xf32, #tpu.memory_space<vmem>>, vector<32x128xf32>
    %cst = arith.constant dense<0.000000e+00> : vector<16x128xf32>
    %2 = tpu.matmul %0, %1, %cst {dimension_numbers = #tpu.dot_dimension_numbers<[1], [0], [0], [1], [0, 0, 1, 1], [], []>} : vector<16x32xf32>, vector<32x128xf32>, vector<16x128xf32> -> vector<16x128xf32>
    %c0_3 = arith.constant 0 : index
    %c0_4 = arith.constant 0 : index
    %3 = vector.load %arg3[%c0_3, %c0_4] : memref<1x128xf32, #tpu.memory_space<vmem>>, vector<1x128xf32>
    %4 = vector.broadcast %3 : vector<1x128xf32> to vector<16x128xf32>
    %5 = arith.addf %2, %4 : vector<16x128xf32>
    %cst_5 = arith.constant 0.000000e+00 : f32
    %6 = vector.broadcast %cst_5 : f32 to vector<16x128xf32>
    %7 = arith.maximumf %5, %6 : vector<16x128xf32>
    %c0_6 = arith.constant 0 : index
    %c0_7 = arith.constant 0 : index
    %8 = vector.load %arg4[%c0_6, %c0_7] : memref<128x32xf32, #tpu.memory_space<vmem>>, vector<128x32xf32>
    %cst_8 = arith.constant dense<0.000000e+00> : vector<16x32xf32>
    %9 = tpu.matmul %7, %8, %cst_8 {dimension_numbers = #tpu.dot_dimension_numbers<[1], [0], [0], [1], [0, 0, 1, 1], [], []>} : vector<16x128xf32>, vector<128x32xf32>, vector<16x32xf32> -> vector<16x32xf32>
    %c0_9 = arith.constant 0 : index
    %c0_10 = arith.constant 0 : index
    %10 = vector.load %arg5[%c0_9, %c0_10] : memref<1x32xf32, #tpu.memory_space<vmem>>, vector<1x32xf32>
    %11 = vector.broadcast %10 : vector<1x32xf32> to vector<16x32xf32>
    %12 = arith.addf %9, %11 : vector<16x32xf32>
    %13 = arith.addf %12, %0 : vector<16x32xf32>
    %cst_11 = arith.constant dense<0.000000e+00> : vector<16xf32>
    %14 = vector.multi_reduction <add>, %13, %cst_11 [1] : vector<16x32xf32> to vector<16xf32>
    %15 = vector.shape_cast %14 : vector<16xf32> to vector<16x1xf32>
    %cst_12 = arith.constant 3.200000e+01 : f32
    %16 = vector.broadcast %cst_12 : f32 to vector<16x1xf32>
    %17 = arith.divf %15, %16 : vector<16x1xf32>
    %18 = vector.broadcast %17 : vector<16x1xf32> to vector<16x32xf32>
    %19 = arith.subf %13, %18 : vector<16x32xf32>
    %20 = arith.mulf %19, %19 : vector<16x32xf32>
    %cst_13 = arith.constant dense<0.000000e+00> : vector<16xf32>
    %21 = vector.multi_reduction <add>, %20, %cst_13 [1] : vector<16x32xf32> to vector<16xf32>
    %22 = vector.shape_cast %21 : vector<16xf32> to vector<16x1xf32>
    %cst_14 = arith.constant 3.200000e+01 : f32
    %23 = vector.broadcast %cst_14 : f32 to vector<16x1xf32>
    %24 = arith.divf %22, %23 : vector<16x1xf32>
    %cst_15 = arith.constant 9.99999974E-6 : f32
    %25 = vector.broadcast %cst_15 : f32 to vector<16x1xf32>
    %26 = arith.addf %24, %25 : vector<16x1xf32>
    %27 = math.rsqrt %26 : vector<16x1xf32>
    %28 = vector.broadcast %27 : vector<16x1xf32> to vector<16x32xf32>
    %29 = arith.mulf %19, %28 : vector<16x32xf32>
    %c0_16 = arith.constant 0 : index
    %c0_17 = arith.constant 0 : index
    %30 = vector.load %arg6[%c0_16, %c0_17] : memref<1x32xf32, #tpu.memory_space<vmem>>, vector<1x32xf32>
    %31 = vector.broadcast %30 : vector<1x32xf32> to vector<16x32xf32>
    %32 = arith.mulf %29, %31 : vector<16x32xf32>
    %c0_18 = arith.constant 0 : index
    %c0_19 = arith.constant 0 : index
    %33 = vector.load %arg7[%c0_18, %c0_19] : memref<1x32xf32, #tpu.memory_space<vmem>>, vector<1x32xf32>
    %34 = vector.broadcast %33 : vector<1x32xf32> to vector<16x32xf32>
    %35 = arith.addf %32, %34 : vector<16x32xf32>
    %c0_20 = arith.constant 0 : index
    %c0_21 = arith.constant 0 : index
    %36 = vector.load %arg8[%c0_20, %c0_21] : memref<16x32xf32, #tpu.memory_space<vmem>>, vector<16x32xf32>
    tpu.vector_store %arg8[%c0_20, %c0_21], %35 {strides = array<i32>} : memref<16x32xf32, #tpu.memory_space<vmem>>, vector<16x32xf32>,
    return
  }
  func.func @transform_0(%arg0: i32) -> (i32, i32) {
    %c0_i32 = arith.constant 0 : i32
    %c0_i32_0 = arith.constant 0 : i32
    return %arg0, %c0_i32 : i32, i32
  }
  func.func @transform_1(%arg0: i32) -> (i32, i32) {
    %c0_i32 = arith.constant 0 : i32
    %c0_i32_0 = arith.constant 0 : i32
    %c0_i32_1 = arith.constant 0 : i32
    return %c0_i32, %c0_i32_0 : i32, i32
  }
  func.func @transform_2(%arg0: i32) -> (i32, i32) {
    %c0_i32 = arith.constant 0 : i32
    %c0_i32_0 = arith.constant 0 : i32
    %c0_i32_1 = arith.constant 0 : i32
    return %c0_i32, %c0_i32_0 : i32, i32
  }
  func.func @transform_3(%arg0: i32) -> (i32, i32) {
    %c0_i32 = arith.constant 0 : i32
    %c0_i32_0 = arith.constant 0 : i32
    %c0_i32_1 = arith.constant 0 : i32
    return %c0_i32, %c0_i32_0 : i32, i32
  }
  func.func @transform_4(%arg0: i32) -> (i32, i32) {
    %c0_i32 = arith.constant 0 : i32
    %c0_i32_0 = arith.constant 0 : i32
    %c0_i32_1 = arith.constant 0 : i32
    return %c0_i32, %c0_i32_0 : i32, i32
  }
  func.func @transform_5(%arg0: i32) -> (i32, i32) {
    %c0_i32 = arith.constant 0 : i32
    %c0_i32_0 = arith.constant 0 : i32
    %c0_i32_1 = arith.constant 0 : i32
    return %c0_i32, %c0_i32_0 : i32, i32
  }
  func.func @transform_6(%arg0: i32) -> (i32, i32) {
    %c0_i32 = arith.constant 0 : i32
    %c0_i32_0 = arith.constant 0 : i32
    %c0_i32_1 = arith.constant 0 : i32
    return %c0_i32, %c0_i32_0 : i32, i32
  }
  func.func @transform_7(%arg0: i32) -> (i32, i32) {
    %c0_i32 = arith.constant 0 : i32
    %c0_i32_0 = arith.constant 0 : i32
    return %arg0, %c0_i32 : i32, i32
  }
}

module attributes {stable_mosaic.version = 11 : i64} {
  func.func @_lstm_recurrent_kernel(%arg0: i32, %arg1: memref<1x2x128xf32, #tpu.memory_space<vmem>>, %arg2: memref<32x128xf32, #tpu.memory_space<vmem>>, %arg3: memref<1x2x32xf32, #tpu.memory_space<vmem>>, %arg4: memref<2x32xf32, #tpu.memory_space<vmem>>, %arg5: memref<2x32xf32, #tpu.memory_space<vmem>>) attributes {dimension_semantics = [#tpu.dimension_semantics<arbitrary>], iteration_bounds = array<i64: 8>, scalar_prefetch = 0 : i64, scratch_operands = 2 : i64, tpu.core_type = #tpu.core_type<tc>, window_params = [{transform_indices = @transform_0, window_bounds = array<i64: 1, 2, 128>}, {pipeline_mode = #tpu.pipeline_mode<synchronous>, transform_indices = @transform_1, window_bounds = array<i64: 32, 128>}, {transform_indices = @transform_2, window_bounds = array<i64: 1, 2, 32>}]} {
    %c0_i32 = arith.constant 0 : i32
    %0 = arith.cmpi eq, %arg0, %c0_i32 : i32
    %1 = arith.extui %0 : i1 to i32
    %c0_i32_0 = arith.constant 0 : i32
    %2 = arith.cmpi ne, %1, %c0_i32_0 : i32
    scf.if %2 {
      %cst_19 = arith.constant 0.000000e+00 : f32
      %40 = vector.broadcast %cst_19 : f32 to vector<2x32xf32>
      %c0_20 = arith.constant 0 : index
      %c0_21 = arith.constant 0 : index
      %41 = vector.load %arg4[%c0_20, %c0_21] : memref<2x32xf32, #tpu.memory_space<vmem>>, vector<2x32xf32>
      tpu.vector_store %arg4[%c0_20, %c0_21], %40 {strides = array<i32>} : memref<2x32xf32, #tpu.memory_space<vmem>>, vector<2x32xf32>,
      %cst_22 = arith.constant 0.000000e+00 : f32
      %42 = vector.broadcast %cst_22 : f32 to vector<2x32xf32>
      %c0_23 = arith.constant 0 : index
      %c0_24 = arith.constant 0 : index
      %43 = vector.load %arg5[%c0_23, %c0_24] : memref<2x32xf32, #tpu.memory_space<vmem>>, vector<2x32xf32>
      tpu.vector_store %arg5[%c0_23, %c0_24], %42 {strides = array<i32>} : memref<2x32xf32, #tpu.memory_space<vmem>>, vector<2x32xf32>,
    } else {
    }
    %c0 = arith.constant 0 : index
    %c0_1 = arith.constant 0 : index
    %c0_2 = arith.constant 0 : index
    %3 = vector.load %arg1[%c0, %c0_1, %c0_2] : memref<1x2x128xf32, #tpu.memory_space<vmem>>, vector<1x2x128xf32>
    %4 = vector.shape_cast %3 : vector<1x2x128xf32> to vector<2x128xf32>
    %c0_3 = arith.constant 0 : index
    %c0_4 = arith.constant 0 : index
    %5 = vector.load %arg4[%c0_3, %c0_4] : memref<2x32xf32, #tpu.memory_space<vmem>>, vector<2x32xf32>
    %c0_5 = arith.constant 0 : index
    %c0_6 = arith.constant 0 : index
    %6 = vector.load %arg2[%c0_5, %c0_6] : memref<32x128xf32, #tpu.memory_space<vmem>>, vector<32x128xf32>
    %cst = arith.constant dense<0.000000e+00> : vector<2x128xf32>
    %7 = tpu.matmul %5, %6, %cst {dimension_numbers = #tpu.dot_dimension_numbers<[1], [0], [0], [1], [0, 0, 1, 1], [], []>} : vector<2x32xf32>, vector<32x128xf32>, vector<2x128xf32> -> vector<2x128xf32>
    %8 = arith.addf %4, %7 : vector<2x128xf32>
    %9 = vector.extract_strided_slice %8 {offsets = [0, 0], sizes = [2, 32], strides = [1, 1]} : vector<2x128xf32> to vector<2x32xf32>
    %10 = arith.negf %9 : vector<2x32xf32>
    %11 = math.exp %10 : vector<2x32xf32>
    %cst_7 = arith.constant 1.000000e+00 : f32
    %12 = vector.broadcast %cst_7 : f32 to vector<2x32xf32>
    %13 = arith.addf %12, %11 : vector<2x32xf32>
    %14 = arith.divf %12, %13 : vector<2x32xf32>
    %15 = vector.extract_strided_slice %8 {offsets = [0, 32], sizes = [2, 32], strides = [1, 1]} : vector<2x128xf32> to vector<2x32xf32>
    %16 = arith.negf %15 : vector<2x32xf32>
    %17 = math.exp %16 : vector<2x32xf32>
    %cst_8 = arith.constant 1.000000e+00 : f32
    %18 = vector.broadcast %cst_8 : f32 to vector<2x32xf32>
    %19 = arith.addf %18, %17 : vector<2x32xf32>
    %20 = arith.divf %18, %19 : vector<2x32xf32>
    %21 = vector.extract_strided_slice %8 {offsets = [0, 64], sizes = [2, 32], strides = [1, 1]} : vector<2x128xf32> to vector<2x32xf32>
    %22 = math.tanh %21 : vector<2x32xf32>
    %23 = vector.extract_strided_slice %8 {offsets = [0, 96], sizes = [2, 32], strides = [1, 1]} : vector<2x128xf32> to vector<2x32xf32>
    %24 = arith.negf %23 : vector<2x32xf32>
    %25 = math.exp %24 : vector<2x32xf32>
    %cst_9 = arith.constant 1.000000e+00 : f32
    %26 = vector.broadcast %cst_9 : f32 to vector<2x32xf32>
    %27 = arith.addf %26, %25 : vector<2x32xf32>
    %28 = arith.divf %26, %27 : vector<2x32xf32>
    %c0_10 = arith.constant 0 : index
    %c0_11 = arith.constant 0 : index
    %29 = vector.load %arg5[%c0_10, %c0_11] : memref<2x32xf32, #tpu.memory_space<vmem>>, vector<2x32xf32>
    %30 = arith.mulf %20, %29 : vector<2x32xf32>
    %31 = arith.mulf %14, %22 : vector<2x32xf32>
    %32 = arith.addf %30, %31 : vector<2x32xf32>
    %33 = math.tanh %32 : vector<2x32xf32>
    %34 = arith.mulf %28, %33 : vector<2x32xf32>
    %c0_12 = arith.constant 0 : index
    %c0_13 = arith.constant 0 : index
    %35 = vector.load %arg5[%c0_12, %c0_13] : memref<2x32xf32, #tpu.memory_space<vmem>>, vector<2x32xf32>
    tpu.vector_store %arg5[%c0_12, %c0_13], %32 {strides = array<i32>} : memref<2x32xf32, #tpu.memory_space<vmem>>, vector<2x32xf32>,
    %c0_14 = arith.constant 0 : index
    %c0_15 = arith.constant 0 : index
    %36 = vector.load %arg4[%c0_14, %c0_15] : memref<2x32xf32, #tpu.memory_space<vmem>>, vector<2x32xf32>
    tpu.vector_store %arg4[%c0_14, %c0_15], %34 {strides = array<i32>} : memref<2x32xf32, #tpu.memory_space<vmem>>, vector<2x32xf32>,
    %c0_16 = arith.constant 0 : index
    %c0_17 = arith.constant 0 : index
    %c0_18 = arith.constant 0 : index
    %37 = vector.load %arg3[%c0_16, %c0_17, %c0_18] : memref<1x2x32xf32, #tpu.memory_space<vmem>>, vector<1x2x32xf32>
    %38 = vector.shape_cast %37 : vector<1x2x32xf32> to vector<2x32xf32>
    %39 = vector.shape_cast %34 : vector<2x32xf32> to vector<1x2x32xf32>
    tpu.vector_store %arg3[%c0_16, %c0_17, %c0_18], %39 {strides = array<i32>} : memref<1x2x32xf32, #tpu.memory_space<vmem>>, vector<1x2x32xf32>,
    return
  }
  func.func @transform_0(%arg0: i32) -> (i32, i32, i32) {
    %c0_i32 = arith.constant 0 : i32
    %c0_i32_0 = arith.constant 0 : i32
    %c0_i32_1 = arith.constant 0 : i32
    return %arg0, %c0_i32, %c0_i32_0 : i32, i32, i32
  }
  func.func @transform_1(%arg0: i32) -> (i32, i32) {
    %c0_i32 = arith.constant 0 : i32
    %c0_i32_0 = arith.constant 0 : i32
    %c0_i32_1 = arith.constant 0 : i32
    return %c0_i32, %c0_i32_0 : i32, i32
  }
  func.func @transform_2(%arg0: i32) -> (i32, i32, i32) {
    %c0_i32 = arith.constant 0 : i32
    %c0_i32_0 = arith.constant 0 : i32
    %c0_i32_1 = arith.constant 0 : i32
    return %arg0, %c0_i32, %c0_i32_0 : i32, i32, i32
  }
}

module attributes {stable_mosaic.version = 11 : i64} {
  func.func @_linear_kernel(%arg0: i32, %arg1: memref<16x32xf32, #tpu.memory_space<vmem>>, %arg2: memref<32x128xf32, #tpu.memory_space<vmem>>, %arg3: memref<1x128xf32, #tpu.memory_space<vmem>>, %arg4: memref<16x128xf32, #tpu.memory_space<vmem>>) attributes {dimension_semantics = [#tpu.dimension_semantics<parallel>], iteration_bounds = array<i64: 1>, scalar_prefetch = 0 : i64, scratch_operands = 0 : i64, tpu.core_type = #tpu.core_type<tc>, window_params = [{transform_indices = @transform_0, window_bounds = array<i64: 16, 32>}, {pipeline_mode = #tpu.pipeline_mode<synchronous>, transform_indices = @transform_1, window_bounds = array<i64: 32, 128>}, {pipeline_mode = #tpu.pipeline_mode<synchronous>, transform_indices = @transform_2, window_bounds = array<i64: 1, 128>}, {transform_indices = @transform_3, window_bounds = array<i64: 16, 128>}]} {
    %c0 = arith.constant 0 : index
    %c0_0 = arith.constant 0 : index
    %0 = vector.load %arg1[%c0, %c0_0] : memref<16x32xf32, #tpu.memory_space<vmem>>, vector<16x32xf32>
    %c0_1 = arith.constant 0 : index
    %c0_2 = arith.constant 0 : index
    %1 = vector.load %arg2[%c0_1, %c0_2] : memref<32x128xf32, #tpu.memory_space<vmem>>, vector<32x128xf32>
    %cst = arith.constant dense<0.000000e+00> : vector<16x128xf32>
    %2 = tpu.matmul %0, %1, %cst {dimension_numbers = #tpu.dot_dimension_numbers<[1], [0], [0], [1], [0, 0, 1, 1], [], []>} : vector<16x32xf32>, vector<32x128xf32>, vector<16x128xf32> -> vector<16x128xf32>
    %c0_3 = arith.constant 0 : index
    %c0_4 = arith.constant 0 : index
    %3 = vector.load %arg3[%c0_3, %c0_4] : memref<1x128xf32, #tpu.memory_space<vmem>>, vector<1x128xf32>
    %4 = vector.broadcast %3 : vector<1x128xf32> to vector<16x128xf32>
    %5 = arith.addf %2, %4 : vector<16x128xf32>
    %c0_5 = arith.constant 0 : index
    %c0_6 = arith.constant 0 : index
    %6 = vector.load %arg4[%c0_5, %c0_6] : memref<16x128xf32, #tpu.memory_space<vmem>>, vector<16x128xf32>
    tpu.vector_store %arg4[%c0_5, %c0_6], %5 {strides = array<i32>} : memref<16x128xf32, #tpu.memory_space<vmem>>, vector<16x128xf32>,
    return
  }
  func.func @transform_0(%arg0: i32) -> (i32, i32) {
    %c0_i32 = arith.constant 0 : i32
    %c0_i32_0 = arith.constant 0 : i32
    return %arg0, %c0_i32 : i32, i32
  }
  func.func @transform_1(%arg0: i32) -> (i32, i32) {
    %c0_i32 = arith.constant 0 : i32
    %c0_i32_0 = arith.constant 0 : i32
    %c0_i32_1 = arith.constant 0 : i32
    return %c0_i32, %c0_i32_0 : i32, i32
  }
  func.func @transform_2(%arg0: i32) -> (i32, i32) {
    %c0_i32 = arith.constant 0 : i32
    %c0_i32_0 = arith.constant 0 : i32
    %c0_i32_1 = arith.constant 0 : i32
    return %c0_i32, %c0_i32_0 : i32, i32
  }
  func.func @transform_3(%arg0: i32) -> (i32, i32) {
    %c0_i32 = arith.constant 0 : i32
    %c0_i32_0 = arith.constant 0 : i32
    return %arg0, %c0_i32 : i32, i32
  }
}

module attributes {stable_mosaic.version = 11 : i64} {
  func.func @_mlp_kernel(%arg0: i32, %arg1: memref<16x64xf32, #tpu.memory_space<vmem>>, %arg2: memref<64x64xf32, #tpu.memory_space<vmem>>, %arg3: memref<1x64xf32, #tpu.memory_space<vmem>>, %arg4: memref<64x8xf32, #tpu.memory_space<vmem>>, %arg5: memref<1x8xf32, #tpu.memory_space<vmem>>, %arg6: memref<16x8xf32, #tpu.memory_space<vmem>>) attributes {dimension_semantics = [#tpu.dimension_semantics<parallel>], iteration_bounds = array<i64: 1>, scalar_prefetch = 0 : i64, scratch_operands = 0 : i64, tpu.core_type = #tpu.core_type<tc>, window_params = [{transform_indices = @transform_0, window_bounds = array<i64: 16, 64>}, {pipeline_mode = #tpu.pipeline_mode<synchronous>, transform_indices = @transform_1, window_bounds = array<i64: 64, 64>}, {pipeline_mode = #tpu.pipeline_mode<synchronous>, transform_indices = @transform_2, window_bounds = array<i64: 1, 64>}, {pipeline_mode = #tpu.pipeline_mode<synchronous>, transform_indices = @transform_3, window_bounds = array<i64: 64, 8>}, {pipeline_mode = #tpu.pipeline_mode<synchronous>, transform_indices = @transform_4, window_bounds = array<i64: 1, 8>}, {transform_indices = @transform_5, window_bounds = array<i64: 16, 8>}]} {
    %c0 = arith.constant 0 : index
    %c0_0 = arith.constant 0 : index
    %0 = vector.load %arg1[%c0, %c0_0] : memref<16x64xf32, #tpu.memory_space<vmem>>, vector<16x64xf32>
    %c0_1 = arith.constant 0 : index
    %c0_2 = arith.constant 0 : index
    %1 = vector.load %arg2[%c0_1, %c0_2] : memref<64x64xf32, #tpu.memory_space<vmem>>, vector<64x64xf32>
    %cst = arith.constant dense<0.000000e+00> : vector<16x64xf32>
    %2 = tpu.matmul %0, %1, %cst {dimension_numbers = #tpu.dot_dimension_numbers<[1], [0], [0], [1], [0, 0, 1, 1], [], []>} : vector<16x64xf32>, vector<64x64xf32>, vector<16x64xf32> -> vector<16x64xf32>
    %c0_3 = arith.constant 0 : index
    %c0_4 = arith.constant 0 : index
    %3 = vector.load %arg3[%c0_3, %c0_4] : memref<1x64xf32, #tpu.memory_space<vmem>>, vector<1x64xf32>
    %4 = vector.broadcast %3 : vector<1x64xf32> to vector<16x64xf32>
    %5 = arith.addf %2, %4 : vector<16x64xf32>
    %cst_5 = arith.constant 0.000000e+00 : f32
    %6 = vector.broadcast %cst_5 : f32 to vector<16x64xf32>
    %7 = arith.maximumf %5, %6 : vector<16x64xf32>
    %c0_6 = arith.constant 0 : index
    %c0_7 = arith.constant 0 : index
    %8 = vector.load %arg4[%c0_6, %c0_7] : memref<64x8xf32, #tpu.memory_space<vmem>>, vector<64x8xf32>
    %cst_8 = arith.constant dense<0.000000e+00> : vector<16x8xf32>
    %9 = tpu.matmul %7, %8, %cst_8 {dimension_numbers = #tpu.dot_dimension_numbers<[1], [0], [0], [1], [0, 0, 1, 1], [], []>} : vector<16x64xf32>, vector<64x8xf32>, vector<16x8xf32> -> vector<16x8xf32>
    %c0_9 = arith.constant 0 : index
    %c0_10 = arith.constant 0 : index
    %10 = vector.load %arg5[%c0_9, %c0_10] : memref<1x8xf32, #tpu.memory_space<vmem>>, vector<1x8xf32>
    %11 = vector.broadcast %10 : vector<1x8xf32> to vector<16x8xf32>
    %12 = arith.addf %9, %11 : vector<16x8xf32>
    %c0_11 = arith.constant 0 : index
    %c0_12 = arith.constant 0 : index
    %13 = vector.load %arg6[%c0_11, %c0_12] : memref<16x8xf32, #tpu.memory_space<vmem>>, vector<16x8xf32>
    tpu.vector_store %arg6[%c0_11, %c0_12], %12 {strides = array<i32>} : memref<16x8xf32, #tpu.memory_space<vmem>>, vector<16x8xf32>,
    return
  }
  func.func @transform_0(%arg0: i32) -> (i32, i32) {
    %c0_i32 = arith.constant 0 : i32
    %c0_i32_0 = arith.constant 0 : i32
    return %arg0, %c0_i32 : i32, i32
  }
  func.func @transform_1(%arg0: i32) -> (i32, i32) {
    %c0_i32 = arith.constant 0 : i32
    %c0_i32_0 = arith.constant 0 : i32
    %c0_i32_1 = arith.constant 0 : i32
    return %c0_i32, %c0_i32_0 : i32, i32
  }
  func.func @transform_2(%arg0: i32) -> (i32, i32) {
    %c0_i32 = arith.constant 0 : i32
    %c0_i32_0 = arith.constant 0 : i32
    %c0_i32_1 = arith.constant 0 : i32
    return %c0_i32, %c0_i32_0 : i32, i32
  }
  func.func @transform_3(%arg0: i32) -> (i32, i32) {
    %c0_i32 = arith.constant 0 : i32
    %c0_i32_0 = arith.constant 0 : i32
    %c0_i32_1 = arith.constant 0 : i32
    return %c0_i32, %c0_i32_0 : i32, i32
  }
  func.func @transform_4(%arg0: i32) -> (i32, i32) {
    %c0_i32 = arith.constant 0 : i32
    %c0_i32_0 = arith.constant 0 : i32
    %c0_i32_1 = arith.constant 0 : i32
    return %c0_i32, %c0_i32_0 : i32, i32
  }
  func.func @transform_5(%arg0: i32) -> (i32, i32) {
    %c0_i32 = arith.constant 0 : i32
    %c0_i32_0 = arith.constant 0 : i32
    return %arg0, %c0_i32 : i32, i32
  }
}

</mosaic_0001>

<bundles_post_ra>
// kernel: hybrid_lstm_transformer_forward.18
= control target key start
LH: loop header
LB: loop body
LE: loop exit
PB: predicated region body
PF: predicated region fallthrough
CT: control target
= control target key end

     0   :  { %s405_s15 = smov 0   ;;  %s434_s0 = inlined_call_operand.vmem [shape: f32[2,8,16], index: 0, kind: input, shape index: {}]   ;;  %s435_s1 = inlined_call_operand.vmem [shape: f32[16,32], index: 1, kind: input, shape index: {}]   ;;  %s436_s2 = inlined_call_operand.vmem [shape: f32[1,32], index: 2, kind: input, shape index: {}]   ;;  %s437_s3 = inlined_call_operand.vmem [shape: f32[8,32], index: 3, kind: input, shape index: {}]   ;;  %s438_s4 = inlined_call_operand.vmem [shape: f32[2,8,32], index: 4, kind: output, shape index: {}]  }
   0x1 LB: > { %s334_s16 = sadd.s32 4294967295, %s375_s15   ;;  %p338_p0 = scmp.ge.s32.totalorder %s375_s15, 1  ;;  %s375_s15 = sphi %s405_s15, %s14_s15  }
   0x2   : > { %p161_p1 = scmp.lt.s32.totalorder %s375_s15, 3 }
   0x4   : > { %p162_p2 = pnand %p338_p0, %p161_p1 }
   0x5   : > { %v194_v0 = vld [vmem:[%s435_s1] sm:$0xff] (!%p162_p2)  ;;  %v195_v1 = vld [vmem:[%s435_s1 + $0x8] sm:$0xff] (!%p162_p2)  ;;  %p185_p3 = scmp.lt.s32.totalorder (!%p162_p2), %s334_s16, 1  ;;  %v377_v2 = vmov (!%p162_p2), 0.0|0.0   ;;  %vm378_vm0 = vmmov (!%p162_p2), 0   ;;  %v379_v4 = vmov (!%p162_p2), 0.0  }
   0x6   : > { %165 = sbr.rel (%p162_p2) target bundleno = 234 (0xea), region = 36  ;;  %355 = vmatprep.subr.bf16.mxu0 (!%p162_p2), %v377_v2  ;;  %v356_v3 = vpack.c.bf16 (!%p162_p2), %v195_v1, %v194_v0  ;;  %352 = vmatprep.mubr.msk.f32.mxu0 (!%p162_p2), %vm378_vm0, %v379_v4  ;;  %vm203_vm1 = vcmask (!%p162_p2), 130048   ;;  %v341_v6 = vld [vmem:[%s436_s2] ss:$0 sm:$0xff] (!%p162_p2)  ;;  %vm279_vm2 = vcmask (!%p162_p2), 261120  }
   0x7   : > { %v277_v8 = vld [vmem:[%s437_s3] sm:$0xff] (!%p162_p2) }
   0x8   : > { %357 = vmatpush3.bf16.msra.mxu0 (!%p162_p2), %v356_v3 }
   0xd   : > { %s440_s16 = smov (!%p185_p3, %s334_s16), 1 }
   0xe   : > { %s339_s21 = sshll.u32 %s440_s16, 3 }
   0xf   : > { %s188_s24 = scalar_lea.vmem %s434_s0, %s339_s21  ;;  %s192_s5 = scalar_lea.vmem %s438_s4, %s339_s21 }
  0x10   : > { %v193_v5 = vld [vmem:[%s188_s24] sm:$0xff] }
  0x11   : > { %353 = vmatmul.mubr.msk.f32.vlgmr.msra.gmra.mrb[0].mxu0 %vm203_vm1, %v193_v5 }
  0xe4   : > { %v273_v7 = vpop.f32.mrb[0].mxu0 }
  0xe5   : > { %v274_v9 = vadd.f32 %v341_v6, %v273_v7  ;;  %v354_v10 = vpop.f32.mrb[1].mxu0 }
  0xe7   : > { %v278_v11 = vadd.f32 %v277_v8, %v274_v9 }
  0xe9   : > { %280 = vst.msk [vmem:[%s192_s5] sm:$0xff] %vm279_vm2, %v278_v11 }
  0xea PF: > { %s14_s15 = sadd.s32 1, %s375_s15  }
  0xeb   : > { %p11_p4 = scmp.ge.s32.totalorder %s14_s15, 4  }
  0xed   :  { %13 = sbr.rel (!%p11_p4) target bundleno = 1 (0x1), region = 66 }

// kernel: hybrid_lstm_transformer_forward.19
= control target key start
LH: loop header
LB: loop body
LE: loop exit
PB: predicated region body
PF: predicated region fallthrough
CT: control target
= control target key end

     0   :  { %vm42_vm0 = vcmask 261120   ;;  %s529_s1 = inlined_call_operand.vmem [shape: f32[32,32], index: 1, kind: input, shape index: {}]   ;;  %s530_s0 = inlined_call_operand.vmem [shape: f32[16,32], index: 0, kind: input, shape index: {}]   ;;  %s531_s2 = inlined_call_operand.vmem [shape: f32[32,32], index: 2, kind: input, shape index: {}]   ;;  %s532_s3 = inlined_call_operand.vmem [shape: f32[32,32], index: 3, kind: input, shape index: {}]   ;;  %s533_s4 = inlined_call_operand.vmem [shape: f32[1,32], index: 4, kind: input, shape index: {}]   ;;  %s534_s5 = inlined_call_operand.vmem [shape: f32[1,32], index: 5, kind: input, shape index: {}]   ;;  %s535_s7 = inlined_call_operand.vmem [shape: f32[16,32], index: 7, kind: output, shape index: {0}]   ;;  %s536_s8 = inlined_call_operand.vmem [shape: f32[16,32], index: 8, kind: output, shape index: {1}]   ;;  %s537_s6 = inlined_call_operand.vmem [shape: f32[1,32], index: 6, kind: input, shape index: {}]   ;;  %s538_s9 = inlined_call_operand.vmem [shape: f32[16,32], index: 9, kind: output, shape index: {2}]  }
   0x1   :  { %v31_v0 = vld [vmem:[%s529_s1] sm:$0xff]  ;;  %v32_v1 = vld [vmem:[%s529_s1 + $0x8] sm:$0xff]  ;;  %v33_v2 = vld [vmem:[%s529_s1 + $0x10] sm:$0xff] }
   0x2   :  { %v374_v3 = vpack.c.bf16 %v32_v1, %v31_v0  ;;  %v34_v4 = vld [vmem:[%s529_s1 + $0x18] sm:$0xff]  ;;  %v29_v5 = vld [vmem:[%s530_s0] sm:$0xff]  ;;  %v127_v8 = vld [vmem:[%s531_s2 + $0x8] sm:$0xff] }
   0x3   :  { %v126_v6 = vld [vmem:[%s531_s2] sm:$0xff]  ;;  %v378_v7 = vpack.c.bf16 %v34_v4, %v33_v2  ;;  %349 = vmatprep.mubr.msk.f32.mxu0 %vm42_vm0, %v29_v5  ;;  %360 = vmatprep.mubr.msk.f32.mxu1 %vm42_vm0, %v29_v5  ;;  %v215_v11 = vld [vmem:[%s532_s3 + $0x8] sm:$0xff]  ;;  %v128_v12 = vld [vmem:[%s531_s2 + $0x10] sm:$0xff] }
   0x4   :  { %v214_v9 = vld [vmem:[%s532_s3] sm:$0xff]  ;;  %375 = vmatprep.subr.bf16.mxu0 %v374_v3  ;;  %v382_v10 = vpack.c.bf16 %v127_v8, %v126_v6  ;;  %v129_v13 = vld [vmem:[%s531_s2 + $0x18] sm:$0xff]  ;;  %v216_v16 = vld [vmem:[%s532_s3 + $0x10] sm:$0xff] }
   0x5   :  { %377 = vmatpush3.bf16.msra.mxu0 %v374_v3  ;;  %v386_v14 = vpack.c.bf16 %v129_v13, %v128_v12  ;;  %v390_v15 = vpack.c.bf16 %v215_v11, %v214_v9  ;;  %v217_v17 = vld [vmem:[%s532_s3 + $0x18] sm:$0xff]  ;;  %v30_v18 = vld [vmem:[%s530_s0 + $0x8] sm:$0xff]  ;;  %v314_v20 = vld [vmem:[%s533_s4] ss:$0 sm:$0xff] }
   0x6   :  { %379 = vmatprep.subr.bf16.mxu0 %v378_v7  ;;  %383 = vmatprep.subr.bf16.mxu1 %v382_v10  ;;  %v394_v19 = vpack.c.bf16 %v217_v17, %v216_v16  ;;  %v317_v22 = vld [vmem:[%s534_s5] ss:$0 sm:$0xff] }
   0x7   :  { %385 = vmatpush3.bf16.msra.mxu1 %v382_v10  ;;  %v320_v30 = vld [vmem:[%s537_s6] ss:$0 sm:$0xff] }
   0x8   :  { %387 = vmatprep.subr.bf16.mxu1 %v386_v14 }
   0x9   :  { %381 = vmatpush3.bf16.msra.mxu0 %v378_v7 }
   0xa   :  { %391 = vmatprep.subr.bf16.mxu0 %v390_v15 }
   0xb   :  { %389 = vmatpush3.bf16.msra.mxu1 %v386_v14 }
   0xc   :  { %350 = vmatmul.mubr.msk.f32.vlgmr.msra.gmra.mrb[0].mxu0 %vm42_vm0, %v30_v18 }
   0xd   :  { %393 = vmatpush3.bf16.msra.mxu0 %v390_v15  ;;  %371 = vmatprep.mubr.msk.f32.mxu0 %vm42_vm0, %v29_v5 }
   0xe   :  { %395 = vmatprep.subr.bf16.mxu0 %v394_v19  ;;  %361 = vmatmul.mubr.msk.f32.vlgmr.msra.gmra.mrb[0].mxu1 %vm42_vm0, %v30_v18 }
  0x11   :  { %397 = vmatpush3.bf16.msra.mxu0 %v394_v19 }
  0x14   :  { %372 = vmatmul.mubr.msk.f32.vlgmr.msra.gmra.mrb[2].mxu0 %vm42_vm0, %v30_v18 }
  0xdf   :  { %v351_v21 = vpop.f32.mrb[0].mxu0 }
  0xe0   :  { %v121_v23 = vadd.f32 %v351_v21, %v314_v20  ;;  %v115_v24 = vpop.f32.mrb[1].mxu0 }
  0xe1   :  { %v116_v25 = vadd.f32 %v314_v20, %v115_v24  ;;  %v362_v26 = vpop.f32.mrb[0].mxu1 }
  0xe2   :  { %125 = vst.msk [vmem:[%s535_s7 + $0x8] sm:$0xff] %vm42_vm0, %v121_v23  ;;  %v209_v27 = vadd.f32 %v362_v26, %v317_v22  ;;  %v203_v28 = vpop.f32.mrb[1].mxu1 }
  0xe3   :  { %124 = vst.msk [vmem:[%s535_s7] sm:$0xff] %vm42_vm0, %v116_v25  ;;  %v204_v29 = vadd.f32 %v317_v22, %v203_v28 }
  0xe4   :  { %213 = vst.msk [vmem:[%s536_s8 + $0x8] sm:$0xff] %vm42_vm0, %v209_v27 }
  0xe5   :  { %212 = vst.msk [vmem:[%s536_s8] sm:$0xff] %vm42_vm0, %v204_v29 }
  0xe7   :  { %v373_v31 = vpop.f32.mrb[2].mxu0 }
  0xe8   :  { %v297_v32 = vadd.f32 %v373_v31, %v320_v30  ;;  %v291_v33 = vpop.f32.mrb[3].mxu0 }
  0xe9   :  { %v292_v34 = vadd.f32 %v320_v30, %v291_v33 }
  0xea   :  { %301 = vst.msk [vmem:[%s538_s9 + $0x8] sm:$0xff] %vm42_vm0, %v297_v32 }
  0xeb   :  { %300 = vst.msk [vmem:[%s538_s9] sm:$0xff] %vm42_vm0, %v292_v34 }

// kernel: hybrid_lstm_transformer_forward.20
= control target key start
LH: loop header
LB: loop body
LE: loop exit
PB: predicated region body
PF: predicated region fallthrough
CT: control target
= control target key end

     0   :  { %s1094_s12 = smov 0   ;;  %s1171_s0 = inlined_call_operand.vmem [shape: f32[2,4,8,8], index: 0, kind: input, shape index: {}]   ;;  %s1172_s1 = inlined_call_operand.vmem [shape: f32[2,4,8,8], index: 1, kind: input, shape index: {}]   ;;  %s1173_s2 = inlined_call_operand.vmem [shape: f32[2,4,8,8], index: 2, kind: input, shape index: {}]   ;;  %s1174_s3 = inlined_call_operand.vmem [shape: f32[2,4,8,8], index: 3, kind: output, shape index: {}]  }
   0x1 LB: > { %s951_s13 = sadd.s32 4294967295, %s1070_s12   ;;  %p955_p0 = scmp.ge.s32.totalorder %s1070_s12, 1  ;;  %s1070_s12 = sphi %s1094_s12, %s13_s12  }
   0x2   : > { %p157_p1 = scmp.lt.s32.totalorder %s1070_s12, 3 }
   0x4   : > { %p158_p2 = pnand %p955_p0, %p157_p1 }
   0x5   : > { %p191_p3 = scmp.lt.s32.totalorder (!%p158_p2), %s951_s13, 1  ;;  %v1072_v0 = vmov (!%p158_p2), 0.0   ;;  %vm1073_vm0 = vmmov (!%p158_p2), 0   ;;  %vm223_vm1 = vcmask (!%p158_p2), 64512  }
   0x6   : > { %161 = sbr.rel (%p158_p2) target bundleno = 769 (0x301), region = 32  ;;  %998 = vmatprep.subr.mxu0 (!%p158_p2), %v1072_v0  ;;  %1000 = vmatprep.mubr.msk.f32.mxu0 (!%p158_p2), %vm1073_vm0, %v1072_v0 }
   0x7   : > { %1003 = vmatprep.subr.mxu1 (!%p158_p2), %v1072_v0  ;;  %1005 = vmatprep.mubr.msk.f32.mxu1 (!%p158_p2), %vm1073_vm0, %v1072_v0 }
   0xd   : > { %s1176_s13 = smov (!%p191_p3, %s951_s13), 1 }
   0xe   : > { %s1108_s14 = sshll.u32 %s1176_s13, 5 }
   0xf   : > { %s200_s17 = scalar_lea.vmem %s1172_s1, %s1108_s14  ;;  %s195_s20 = scalar_lea.vmem %s1171_s0, %s1108_s14 }
  0x10   : > { %v215_v1 = vld [vmem:[%s200_s17] sm:$0xff]  ;;  %v216_v2 = vld [vmem:[%s200_s17 + $0x8] sm:$0xff]  ;;  %v217_v5 = vld [vmem:[%s200_s17 + $0x10] sm:$0xff]  ;;  %s205_s23 = scalar_lea.vmem %s1173_s2, %s1108_s14  ;;  %s210_s26 = scalar_lea.vmem %s1174_s3, %s1108_s14 }
  0x11   : > { %999 = vmatpush3.xpose.msk.msra.mxu0 %vm223_vm1, %v215_v1  ;;  %v211_v3 = vld [vmem:[%s195_s20] sm:$0xff]  ;;  %1004 = vmatpush3.xpose.msk.msra.mxu1 %vm223_vm1, %v216_v2  ;;  %v212_v4 = vld [vmem:[%s195_s20 + $0x8] sm:$0xff]  ;;  %v218_v6 = vld [vmem:[%s200_s17 + $0x18] sm:$0xff] }
  0x12   : > { %1008 = vmatprep.subr.mxu0 %v1072_v0  ;;  %1013 = vmatprep.subr.mxu1 %v1072_v0  ;;  %v213_v7 = vld [vmem:[%s195_s20 + $0x10] sm:$0xff]  ;;  %v214_v8 = vld [vmem:[%s195_s20 + $0x18] sm:$0xff]  ;;  %v219_v45 = vld [vmem:[%s205_s23] sm:$0xff] }
  0x13   : > { %v220_v46 = vld [vmem:[%s205_s23 + $0x8] sm:$0xff]  ;;  %v221_v53 = vld [vmem:[%s205_s23 + $0x10] sm:$0xff]  ;;  %v222_v57 = vld [vmem:[%s205_s23 + $0x18] sm:$0xff] }
  0x14   : > { %1001 = vmatmul.mubr.msk.f32.vlgmr.msra.gmra.mrb[0].mxu0 %vm223_vm1, %v211_v3  ;;  %1006 = vmatmul.mubr.msk.f32.vlgmr.msra.gmra.mrb[0].mxu1 %vm223_vm1, %v212_v4 }
  0x15   : > { %1009 = vmatpush3.xpose.msk.msra.mxu0 %vm223_vm1, %v217_v5  ;;  %1010 = vmatprep.mubr.msk.f32.mxu0 %vm1073_vm0, %v1072_v0 }
  0x16   : > { %1014 = vmatpush3.xpose.msk.msra.mxu1 %vm223_vm1, %v218_v6  ;;  %1015 = vmatprep.mubr.msk.f32.mxu1 %vm1073_vm0, %v1072_v0 }
  0x17   : > { %1018 = vmatprep.subr.mxu0 %v1072_v0  ;;  %1023 = vmatprep.subr.mxu1 %v1072_v0 }
  0x18   : > { %1011 = vmatmul.mubr.msk.f32.vlgmr.msra.gmra.mrb[2].mxu0 %vm223_vm1, %v213_v7 }
  0x19   : > { %1016 = vmatmul.mubr.msk.f32.vlgmr.msra.gmra.mrb[2].mxu1 %vm223_vm1, %v214_v8  ;;  %1020 = vmatprep.mubr.msk.f32.mxu0 %vm1073_vm0, %v1072_v0 }
  0x1a   : > { %1025 = vmatprep.mubr.msk.f32.mxu1 %vm1073_vm0, %v1072_v0  ;;  %1019 = vmatpush3.msra.mxu0 %v219_v45 }
  0x1b   : > { %1028 = vmatprep.subr.mxu0 %v1072_v0  ;;  %1024 = vmatpush3.msra.mxu1 %v220_v46 }
  0x1c   : > { %1033 = vmatprep.subr.mxu1 %v1072_v0 }
  0xe7   : > { %v296_v9 = vpop.f32.mrb[0].mxu0  ;;  %v372_v10 = vpop.f32.mrb[0].mxu1 }
  0xe8   : > { %v528_v11 = vmul.f32 0.35355338, %v296_v9  ;;  %v1002_v12 = vpop.f32.mrb[1].mxu0  ;;  %v529_v13 = vmul.f32 0.35355338, %v372_v10  ;;  %v1007_v14 = vpop.f32.mrb[1].mxu1 }
  0xea   : > { %v532_v15 = vsel %vm223_vm1, %v528_v11, -inf  ;;  %v535_v20 = vsel %vm223_vm1, %v529_v13, -inf }
  0xeb   : > { %533 = vmax.xlane.f32.xlu0 %v532_v15  ;;  %v448_v16 = vpop.f32.mrb[2].mxu0 }
  0xec   : > { %v530_v17 = vmul.f32 0.35355338, %v448_v16  ;;  %v1012_v18 = vpop.f32.mrb[3].mxu0  ;;  %v524_v19 = vpop.f32.mrb[2].mxu1 }
  0xed   : > { %v531_v21 = vmul.f32 0.35355338, %v524_v19  ;;  %v1017_v22 = vpop.f32.mrb[3].mxu1 }
  0xee   : > { %v538_v23 = vsel %vm223_vm1, %v530_v17, -inf }
  0xef   : > { %536 = vmax.xlane.f32.xlu0 %v535_v20  ;;  %539 = vmax.xlane.f32.xlu1 %v538_v23  ;;  %v541_v24 = vsel %vm223_vm1, %v531_v21, -inf }
  0xf3   : > { %542 = vmax.xlane.f32.xlu1 %v541_v24 }
 0x178   : > { %v534_v25 = vpop.xlane.xlu0 %533 }
 0x179   : > { %v544_v26 = vsub.f32 %v528_v11, %v534_v25 }
 0x17b   : > { %v548_v27 = vmul.f32 1.442695, %v544_v26 }
 0x17c   : > { %v537_v28 = vpop.xlane.xlu0 %536  ;;  %v540_v29 = vpop.xlane.xlu1 %539 }
 0x17d   : > { %1048 = vpow2.f32 %v548_v27  ;;  %v545_v30 = vsub.f32 %v529_v13, %v537_v28  ;;  %v546_v31 = vsub.f32 %v530_v17, %v540_v29 }
 0x17f   : > { %v550_v32 = vmul.f32 1.442695, %v545_v30  ;;  %v552_v33 = vmul.f32 1.442695, %v546_v31 }
 0x180   : > { %v543_v34 = vpop.xlane.xlu1 %542 }
 0x181   : > { %1050 = vpow2.f32 %v550_v32  ;;  %v547_v35 = vsub.f32 %v531_v21, %v543_v34 }
 0x182   : > { %1052 = vpow2.f32 %v552_v33 }
 0x183   : > { %v554_v36 = vmul.f32 1.442695, %v547_v35 }
 0x185   : > { %1054 = vpow2.f32 %v554_v36 }
 0x187   : > { %v1049_v37 = vpop.eup %1048 }
 0x188   : > { %v556_v38 = vsel %vm223_vm1, %v1049_v37, 0.0 }
 0x189   : > { %557 = vadd.xlane.f32.xlu0 %v556_v38 }
 0x18b   : > { %v1051_v39 = vpop.eup %1050 }
 0x18c   : > { %v1053_v40 = vpop.eup %1052  ;;  %v559_v41 = vsel %vm223_vm1, %v1051_v39, 0.0 }
 0x18d   : > { %560 = vadd.xlane.f32.xlu1 %v559_v41  ;;  %v562_v42 = vsel %vm223_vm1, %v1053_v40, 0.0 }
 0x18e   : > { %563 = vadd.xlane.f32.xlu0 %v562_v42 }
 0x18f   : > { %v1055_v43 = vpop.eup %1054 }
 0x190   : > { %v565_v44 = vsel %vm223_vm1, %v1055_v43, 0.0 }
 0x191   : > { %566 = vadd.xlane.f32.xlu1 %v565_v44 }
 0x216   : > { %v558_v47 = vpop.xlane.xlu0 %557 }
 0x217   : > { %1056 = vrcp.f32 %v558_v47 }
 0x21a   : > { %v561_v48 = vpop.xlane.xlu1 %560 }
 0x21b   : > { %v564_v49 = vpop.xlane.xlu0 %563  ;;  %1058 = vrcp.f32 %v561_v48 }
 0x21c   : > { %1060 = vrcp.f32 %v564_v49 }
 0x21e   : > { %v567_v50 = vpop.xlane.xlu1 %566 }
 0x21f   : > { %1062 = vrcp.f32 %v567_v50 }
 0x221   : > { %v1057_v51 = vpop.eup %1056 }
 0x222   : > { %v569_v52 = vmul.f32 %v1057_v51, %v1049_v37 }
 0x224   : > { %1021 = vmatmul.mubr.msk.f32.vlgmr.msra.gmra.mrb[4].mxu0 %vm223_vm1, %v569_v52 }
 0x225   : > { %v1059_v54 = vpop.eup %1058  ;;  %1029 = vmatpush3.msra.mxu0 %v221_v53  ;;  %1030 = vmatprep.mubr.msk.f32.mxu0 %vm1073_vm0, %v1072_v0 }
 0x226   : > { %v1061_v55 = vpop.eup %1060  ;;  %v571_v56 = vmul.f32 %v1059_v54, %v1051_v39 }
 0x227   : > { %v573_v58 = vmul.f32 %v1061_v55, %v1053_v40 }
 0x228   : > { %1026 = vmatmul.mubr.msk.f32.vlgmr.msra.gmra.mrb[4].mxu1 %vm223_vm1, %v571_v56 }
 0x229   : > { %v1063_v59 = vpop.eup %1062  ;;  %1031 = vmatmul.mubr.msk.f32.vlgmr.msra.gmra.mrb[6].mxu0 %vm223_vm1, %v573_v58  ;;  %1034 = vmatpush3.msra.mxu1 %v222_v57 }
 0x22a   : > { %v575_v60 = vmul.f32 %v1063_v59, %v1055_v43  ;;  %1035 = vmatprep.mubr.msk.f32.mxu1 %vm1073_vm0, %v1072_v0 }
 0x22c   : > { %1036 = vmatmul.mubr.msk.f32.vlgmr.msra.gmra.mrb[6].mxu1 %vm223_vm1, %v575_v60 }
 0x2f7   : > { %v645_v61 = vpop.f32.mrb[4].mxu0 }
 0x2f8   : > { %868 = vst.msk [vmem:[%s210_s26] sm:$0xff] %vm223_vm1, %v645_v61  ;;  %v1022_v62 = vpop.f32.mrb[5].mxu0 }
 0x2fb   : > { %v718_v63 = vpop.f32.mrb[4].mxu1 }
 0x2fc   : > { %869 = vst.msk [vmem:[%s210_s26 + $0x8] sm:$0xff] %vm223_vm1, %v718_v63  ;;  %v791_v1 = vpop.f32.mrb[6].mxu0  ;;  %v1027_v2 = vpop.f32.mrb[5].mxu1 }
 0x2fd   : > { %870 = vst.msk [vmem:[%s210_s26 + $0x10] sm:$0xff] %vm223_vm1, %v791_v1  ;;  %v1032_v3 = vpop.f32.mrb[7].mxu0 }
 0x2ff   : > { %v864_v4 = vpop.f32.mrb[6].mxu1 }
 0x300   : > { %871 = vst.msk [vmem:[%s210_s26 + $0x18] sm:$0xff] %vm223_vm1, %v864_v4  ;;  %v1037_v0 = vpop.f32.mrb[7].mxu1 }
 0x301 PF: > { %s13_s12 = sadd.s32 1, %s1070_s12  }
 0x302   : > { %p10_p4 = scmp.ge.s32.totalorder %s13_s12, 4  }
 0x304   :  { %12 = sbr.rel (!%p10_p4) target bundleno = 1 (0x1), region = 68 }

// kernel: hybrid_lstm_transformer_forward.21
= control target key start
LH: loop header
LB: loop body
LE: loop exit
PB: predicated region body
PF: predicated region fallthrough
CT: control target
= control target key end

     0   :  { %vm36_vm0 = vcmask 261120   ;;  %s289_s1 = inlined_call_operand.vmem [shape: f32[32,32], index: 1, kind: input, shape index: {}]   ;;  %s290_s0 = inlined_call_operand.vmem [shape: f32[16,32], index: 0, kind: input, shape index: {}]   ;;  %s291_s2 = inlined_call_operand.vmem [shape: f32[1,32], index: 2, kind: input, shape index: {}]   ;;  %s292_s3 = inlined_call_operand.vmem [shape: f32[16,32], index: 3, kind: input, shape index: {}]   ;;  %s293_s4 = inlined_call_operand.vmem [shape: f32[1,32], index: 4, kind: input, shape index: {}]   ;;  %s294_s5 = inlined_call_operand.vmem [shape: f32[1,32], index: 5, kind: input, shape index: {}]   ;;  %s295_s6 = inlined_call_operand.vmem [shape: f32[16,32], index: 6, kind: output, shape index: {}]  }
   0x1   :  { %v25_v0 = vld [vmem:[%s289_s1] sm:$0xff]  ;;  %v26_v1 = vld [vmem:[%s289_s1 + $0x8] sm:$0xff]  ;;  %v27_v2 = vld [vmem:[%s289_s1 + $0x10] sm:$0xff] }
   0x2   :  { %v195_v3 = vpack.c.bf16 %v26_v1, %v25_v0  ;;  %v28_v4 = vld [vmem:[%s289_s1 + $0x18] sm:$0xff]  ;;  %v23_v5 = vld [vmem:[%s290_s0] sm:$0xff]  ;;  %v24_v7 = vld [vmem:[%s290_s0 + $0x8] sm:$0xff] }
   0x3   :  { %v199_v6 = vpack.c.bf16 %v28_v4, %v27_v2  ;;  %192 = vmatprep.mubr.msk.f32.mxu0 %vm36_vm0, %v23_v5  ;;  %v173_v8 = vld [vmem:[%s291_s2] ss:$0 sm:$0xff]  ;;  %v119_v14 = vld [vmem:[%s292_s3 + $0x8] sm:$0xff] }
   0x4   :  { %196 = vmatprep.subr.bf16.mxu0 %v195_v3  ;;  %v118_v11 = vld [vmem:[%s292_s3] sm:$0xff] }
   0x5   :  { %198 = vmatpush3.bf16.msra.mxu0 %v195_v3  ;;  %v176_v36 = vld [vmem:[%s293_s4] ss:$0 sm:$0xff] }
   0x6   :  { %200 = vmatprep.subr.bf16.mxu0 %v199_v6  ;;  %v177_v38 = vld [vmem:[%s294_s5] ss:$0 sm:$0xff] }
   0x9   :  { %202 = vmatpush3.bf16.msra.mxu0 %v199_v6 }
   0xc   :  { %193 = vmatmul.mubr.msk.f32.vlgmr.msra.gmra.mrb[0].mxu0 %vm36_vm0, %v24_v7 }
  0xdf   :  { %v194_v9 = vpop.f32.mrb[0].mxu0 }
  0xe0   :  { %v109_v10 = vpop.f32.mrb[1].mxu0  ;;  %v115_v12 = vadd.f32 %v194_v9, %v173_v8 }
  0xe1   :  { %v110_v13 = vadd.f32 %v173_v8, %v109_v10 }
  0xe2   :  { %v121_v17 = vadd.f32 %v119_v14, %v115_v12 }
  0xe3   :  { %v120_v15 = vadd.f32 %v118_v11, %v110_v13 }
  0xe4   :  { %v125_v18 = vsel %vm36_vm0, %v121_v17, 0.0 }
  0xe5   :  { %v122_v16 = vsel %vm36_vm0, %v120_v15, 0.0 }
  0xe6   :  { %123 = vadd.xlane.f32.xlu0 %v122_v16 }
  0xea   :  { %126 = vadd.xlane.f32.xlu0 %v125_v18 }
 0x173   :  { %v124_v19 = vpop.xlane.xlu0 %123 }
 0x174   :  { %v129_v20 = vmul.f32 0.03125, %v124_v19 }
 0x176   :  { %v131_v21 = vsub.f32 %v120_v15, %v129_v20 }
 0x177   :  { %v127_v22 = vpop.xlane.xlu0 %126 }
 0x178   :  { %v130_v23 = vmul.f32 0.03125, %v127_v22  ;;  %v133_v24 = vmul.f32 %v131_v21, %v131_v21 }
 0x17a   :  { %v132_v25 = vsub.f32 %v121_v17, %v130_v23  ;;  %v135_v26 = vsel %vm36_vm0, %v133_v24, 0.0 }
 0x17b   :  { %136 = vadd.xlane.f32.xlu1 %v135_v26 }
 0x17c   :  { %v134_v27 = vmul.f32 %v132_v25, %v132_v25 }
 0x17e   :  { %v138_v28 = vsel %vm36_vm0, %v134_v27, 0.0 }
 0x17f   :  { %139 = vadd.xlane.f32.xlu1 %v138_v28 }
 0x208   :  { %v137_v29 = vpop.xlane.xlu1 %136 }
 0x209   :  { %v141_v30 = vmul.f32 0.03125, %v137_v29 }
 0x20b   :  { %v143_v31 = vadd.f32 1e-05, %v141_v30 }
 0x20c   :  { %v140_v32 = vpop.xlane.xlu1 %139 }
 0x20d   :  { %203 = vrsqrt.f32 %v143_v31  ;;  %v142_v33 = vmul.f32 0.03125, %v140_v32 }
 0x20f   :  { %v144_v34 = vadd.f32 1e-05, %v142_v33 }
 0x211   :  { %205 = vrsqrt.f32 %v144_v34 }
 0x217   :  { %v204_v35 = vpop.eup %203 }
 0x218   :  { %v147_v37 = vmul.f32 %v204_v35, %v131_v21 }
 0x21a   :  { %v156_v39 = vmul.f32 %v176_v36, %v147_v37 }
 0x21b   :  { %v206_v40 = vpop.eup %205 }
 0x21c   :  { %v165_v41 = vadd.f32 %v177_v38, %v156_v39  ;;  %v148_v42 = vmul.f32 %v206_v40, %v132_v25 }
 0x21e   :  { %167 = vst.msk [vmem:[%s295_s6] sm:$0xff] %vm36_vm0, %v165_v41  ;;  %v157_v43 = vmul.f32 %v176_v36, %v148_v42 }
 0x220   :  { %v166_v44 = vadd.f32 %v177_v38, %v157_v43 }
 0x222   :  { %168 = vst.msk [vmem:[%s295_s6 + $0x8] sm:$0xff] %vm36_vm0, %v166_v44 }

// kernel: hybrid_lstm_transformer_forward.14
= control target key start
LH: loop header
LB: loop body
LE: loop exit
PB: predicated region body
PF: predicated region fallthrough
CT: control target
= control target key end

     0   :  { %vm25_vm0 = vcmask 130048   ;;  %s172_s1 = inlined_call_operand.vmem [shape: f32[16,128], index: 1, kind: input, shape index: {}]   ;;  %s173_s0 = inlined_call_operand.vmem [shape: f32[16,16], index: 0, kind: input, shape index: {}]   ;;  %s174_s2 = inlined_call_operand.vmem [shape: f32[1,128], index: 2, kind: input, shape index: {}]   ;;  %s175_s3 = inlined_call_operand.vmem [shape: f32[16,128], index: 3, kind: output, shape index: {}]  }
   0x1   :  { %v16_v0 = vld [vmem:[%s172_s1] sm:$0xff]  ;;  %v17_v1 = vld [vmem:[%s172_s1 + $0x8] sm:$0xff] }
   0x2   :  { %v14_v2 = vld [vmem:[%s173_s0] sm:$0xff]  ;;  %v127_v3 = vpack.c.bf16 %v17_v1, %v16_v0  ;;  %v15_v4 = vld [vmem:[%s173_s0 + $0x8] sm:$0xff] }
   0x3   :  { %124 = vmatprep.mubr.msk.f32.mxu0 %vm25_vm0, %v14_v2  ;;  %v113_v5 = vld [vmem:[%s174_s2] ss:$0 sm:$0xff] }
   0x4   :  { %128 = vmatprep.subr.bf16.mxu0 %v127_v3 }
   0x5   :  { %130 = vmatpush3.bf16.msra.mxu0 %v127_v3 }
   0x8   :  { %125 = vmatmul.mubr.msk.f32.vlgmr.msra.gmra.mrb[0].mxu0 %vm25_vm0, %v15_v4 }
  0xdb   :  { %v126_v6 = vpop.f32.mrb[0].mxu0 }
  0xdc   :  { %v104_v7 = vadd.f32 %v126_v6, %v113_v5  ;;  %v98_v8 = vpop.f32.mrb[1].mxu0 }
  0xdd   :  { %v99_v9 = vadd.f32 %v113_v5, %v98_v8 }
  0xde   :  { %108 = vst [vmem:[%s175_s3 + $0x8] sm:$0xff] %v104_v7 }
  0xdf   :  { %107 = vst [vmem:[%s175_s3] sm:$0xff] %v99_v9 }

// kernel: hybrid_lstm_transformer_forward.22
= control target key start
LH: loop header
LB: loop body
LE: loop exit
PB: predicated region body
PF: predicated region fallthrough
CT: control target
= control target key end

     0   :  { %vm39_vm0 = vcmask 261120   ;;  %s530_s1 = inlined_call_operand.vmem [shape: f32[32,128], index: 1, kind: input, shape index: {}]   ;;  %s531_s0 = inlined_call_operand.vmem [shape: f32[16,32], index: 0, kind: input, shape index: {}]   ;;  %s532_s3 = inlined_call_operand.vmem [shape: f32[128,32], index: 3, kind: input, shape index: {}]   ;;  %s533_s2 = inlined_call_operand.vmem [shape: f32[1,128], index: 2, kind: input, shape index: {}]   ;;  %s534_s4 = inlined_call_operand.vmem [shape: f32[1,32], index: 4, kind: input, shape index: {}]   ;;  %s535_s5 = inlined_call_operand.vmem [shape: f32[1,32], index: 5, kind: input, shape index: {}]   ;;  %s536_s6 = inlined_call_operand.vmem [shape: f32[1,32], index: 6, kind: input, shape index: {}]   ;;  %s537_s7 = inlined_call_operand.vmem [shape: f32[16,32], index: 7, kind: output, shape index: {}]  }
   0x1   :  { %v28_v0 = vld [vmem:[%s530_s1] sm:$0xff]  ;;  %v29_v1 = vld [vmem:[%s530_s1 + $0x8] sm:$0xff]  ;;  %v30_v2 = vld [vmem:[%s530_s1 + $0x10] sm:$0xff] }
   0x2   :  { %v350_v3 = vpack.c.bf16 %v29_v1, %v28_v0  ;;  %v31_v4 = vld [vmem:[%s530_s1 + $0x18] sm:$0xff]  ;;  %v449_v5 = vld [vmem:[%s531_s0] sm:$0xff]  ;;  %v124_v8 = vld [vmem:[%s532_s3 + $0x8] sm:$0xff] }
   0x3   :  { %v354_v6 = vpack.c.bf16 %v31_v4, %v30_v2  ;;  %312 = vmatprep.mubr.msk.f32.mxu0 %vm39_vm0, %v449_v5  ;;  %v123_v7 = vld [vmem:[%s532_s3] sm:$0xff]  ;;  %v125_v9 = vld [vmem:[%s532_s3 + $0x10] sm:$0xff]  ;;  %v126_v11 = vld [vmem:[%s532_s3 + $0x18] sm:$0xff] }
   0x4   :  { %351 = vmatprep.subr.bf16.mxu0 %v350_v3  ;;  %v358_v10 = vpack.c.bf16 %v124_v8, %v123_v7  ;;  %v362_v12 = vpack.c.bf16 %v126_v11, %v125_v9  ;;  %v127_v13 = vld [vmem:[%s532_s3 + $0x20] sm:$0xff]  ;;  %v128_v14 = vld [vmem:[%s532_s3 + $0x28] sm:$0xff]  ;;  %v129_v17 = vld [vmem:[%s532_s3 + $0x30] sm:$0xff] }
   0x5   :  { %353 = vmatpush3.bf16.msra.mxu0 %v350_v3  ;;  %v366_v15 = vpack.c.bf16 %v128_v14, %v127_v13  ;;  %v27_v16 = vld [vmem:[%s531_s0 + $0x8] sm:$0xff]  ;;  %v130_v18 = vld [vmem:[%s532_s3 + $0x38] sm:$0xff]  ;;  %v131_v20 = vld [vmem:[%s532_s3 + $0x40] sm:$0xff] }
   0x6   :  { %355 = vmatprep.subr.bf16.mxu0 %v354_v6  ;;  %359 = vmatprep.subr.bf16.mxu1 %v358_v10  ;;  %v370_v19 = vpack.c.bf16 %v130_v18, %v129_v17  ;;  %v132_v21 = vld [vmem:[%s532_s3 + $0x48] sm:$0xff]  ;;  %v133_v23 = vld [vmem:[%s532_s3 + $0x50] sm:$0xff]  ;;  %v134_v24 = vld [vmem:[%s532_s3 + $0x58] sm:$0xff] }
   0x7   :  { %361 = vmatpush3.bf16.msra.mxu1 %v358_v10  ;;  %v374_v22 = vpack.c.bf16 %v132_v21, %v131_v20  ;;  %v378_v25 = vpack.c.bf16 %v134_v24, %v133_v23  ;;  %v135_v26 = vld [vmem:[%s532_s3 + $0x60] sm:$0xff]  ;;  %v136_v27 = vld [vmem:[%s532_s3 + $0x68] sm:$0xff]  ;;  %v137_v29 = vld [vmem:[%s532_s3 + $0x70] sm:$0xff] }
   0x8   :  { %363 = vmatprep.subr.bf16.mxu1 %v362_v12  ;;  %v382_v28 = vpack.c.bf16 %v136_v27, %v135_v26  ;;  %v138_v30 = vld [vmem:[%s532_s3 + $0x78] sm:$0xff]  ;;  %v274_v32 = vld [vmem:[%s533_s2] ss:$0 sm:$0xff] }
   0x9   :  { %357 = vmatpush3.bf16.msra.mxu0 %v354_v6  ;;  %v386_v31 = vpack.c.bf16 %v138_v30, %v137_v29  ;;  %v277_v39 = vld [vmem:[%s534_s4] ss:$0 sm:$0xff] }
   0xa   :  { %v278_v1 = vld [vmem:[%s535_s5] ss:$0 sm:$0xff] }
   0xb   :  { %365 = vmatpush3.bf16.msra.mxu1 %v362_v12  ;;  %v279_v3 = vld [vmem:[%s536_s6] ss:$0 sm:$0xff] }
   0xc   :  { %313 = vmatmul.mubr.msk.f32.vlgmr.msra.gmra.mrb[0].mxu0 %vm39_vm0, %v27_v16  ;;  %367 = vmatprep.subr.bf16.mxu1 %v366_v15 }
   0xf   :  { %369 = vmatpush3.bf16.msra.mxu1 %v366_v15 }
  0x10   :  { %371 = vmatprep.subr.bf16.mxu1 %v370_v19 }
  0x13   :  { %373 = vmatpush3.bf16.msra.mxu1 %v370_v19 }
  0x14   :  { %375 = vmatprep.subr.bf16.mxu1 %v374_v22 }
  0x17   :  { %377 = vmatpush3.bf16.msra.mxu1 %v374_v22 }
  0x18   :  { %379 = vmatprep.subr.bf16.mxu1 %v378_v25 }
  0x1b   :  { %381 = vmatpush3.bf16.msra.mxu1 %v378_v25 }
  0x1c   :  { %383 = vmatprep.subr.bf16.mxu1 %v382_v28 }
  0x1f   :  { %385 = vmatpush3.bf16.msra.mxu1 %v382_v28 }
  0x20   :  { %387 = vmatprep.subr.bf16.mxu1 %v386_v31 }
  0x23   :  { %389 = vmatpush3.bf16.msra.mxu1 %v386_v31 }
  0xdf   :  { %v314_v33 = vpop.f32.mrb[0].mxu0 }
  0xe0   :  { %v118_v34 = vadd.f32 %v314_v33, %v274_v32  ;;  %v112_v35 = vpop.f32.mrb[1].mxu0 }
  0xe1   :  { %v113_v36 = vadd.f32 %v274_v32, %v112_v35 }
  0xe2   :  { %v122_v38 = vmax.f32 %v118_v34, 0.0 }
  0xe3   :  { %v121_v37 = vmax.f32 %v113_v36, 0.0 }
  0xe5   :  { %347 = vmatprep.mubr.f32.mxu1 %v121_v37 }
  0xe6   :  { %348 = vmatmul.mubr.f32.vlgmr.msra.gmra.mrb[0].mxu1 %v122_v38 }
 0x1b9   :  { %v349_v40 = vpop.f32.mrb[0].mxu1 }
 0x1ba   :  { %v212_v41 = vpop.f32.mrb[1].mxu1  ;;  %v218_v42 = vadd.f32 %v349_v40, %v277_v39 }
 0x1bb   :  { %v213_v43 = vadd.f32 %v277_v39, %v212_v41 }
 0x1bc   :  { %v222_v46 = vadd.f32 %v218_v42, %v27_v16 }
 0x1bd   :  { %v221_v44 = vadd.f32 %v213_v43, %v449_v5 }
 0x1be   :  { %v226_v47 = vsel %vm39_vm0, %v222_v46, 0.0 }
 0x1bf   :  { %v223_v45 = vsel %vm39_vm0, %v221_v44, 0.0 }
 0x1c0   :  { %224 = vadd.xlane.f32.xlu0 %v223_v45 }
 0x1c4   :  { %227 = vadd.xlane.f32.xlu0 %v226_v47 }
 0x24d   :  { %v225_v48 = vpop.xlane.xlu0 %224 }
 0x24e   :  { %v230_v49 = vmul.f32 0.03125, %v225_v48 }
 0x250   :  { %v232_v50 = vsub.f32 %v221_v44, %v230_v49 }
 0x251   :  { %v228_v51 = vpop.xlane.xlu0 %227 }
 0x252   :  { %v231_v52 = vmul.f32 0.03125, %v228_v51  ;;  %v234_v53 = vmul.f32 %v232_v50, %v232_v50 }
 0x254   :  { %v233_v54 = vsub.f32 %v222_v46, %v231_v52  ;;  %v236_v55 = vsel %vm39_vm0, %v234_v53, 0.0 }
 0x255   :  { %237 = vadd.xlane.f32.xlu1 %v236_v55 }
 0x256   :  { %v235_v56 = vmul.f32 %v233_v54, %v233_v54 }
 0x258   :  { %v239_v57 = vsel %vm39_vm0, %v235_v56, 0.0 }
 0x259   :  { %240 = vadd.xlane.f32.xlu1 %v239_v57 }
 0x2e2   :  { %v238_v58 = vpop.xlane.xlu1 %237 }
 0x2e3   :  { %v242_v59 = vmul.f32 0.03125, %v238_v58 }
 0x2e5   :  { %v244_v60 = vadd.f32 1e-05, %v242_v59 }
 0x2e6   :  { %v241_v61 = vpop.xlane.xlu1 %240 }
 0x2e7   :  { %390 = vrsqrt.f32 %v244_v60  ;;  %v243_v62 = vmul.f32 0.03125, %v241_v61 }
 0x2e9   :  { %v245_v63 = vadd.f32 1e-05, %v243_v62 }
 0x2eb   :  { %392 = vrsqrt.f32 %v245_v63 }
 0x2f1   :  { %v391_v0 = vpop.eup %390 }
 0x2f2   :  { %v248_v2 = vmul.f32 %v391_v0, %v232_v50 }
 0x2f4   :  { %v257_v4 = vmul.f32 %v278_v1, %v248_v2 }
 0x2f5   :  { %v393_v5 = vpop.eup %392 }
 0x2f6   :  { %v266_v6 = vadd.f32 %v279_v3, %v257_v4  ;;  %v249_v7 = vmul.f32 %v393_v5, %v233_v54 }
 0x2f8   :  { %268 = vst.msk [vmem:[%s537_s7] sm:$0xff] %vm39_vm0, %v266_v6  ;;  %v258_v8 = vmul.f32 %v278_v1, %v249_v7 }
 0x2fa   :  { %v267_v9 = vadd.f32 %v279_v3, %v258_v8 }
 0x2fc   :  { %269 = vst.msk [vmem:[%s537_s7 + $0x8] sm:$0xff] %vm39_vm0, %v267_v9 }

// kernel: hybrid_lstm_transformer_forward.15
= control target key start
LH: loop header
LB: loop body
LE: loop exit
PB: predicated region body
PF: predicated region fallthrough
CT: control target
= control target key end

     0   :  { %s408_s9 = smov 0   ;;  %s440_s0 = inlined_call_operand.vmem [shape: f32[8,2,128], index: 0, kind: input, shape index: {}]   ;;  %s441_s1 = inlined_call_operand.vmem [shape: f32[32,128], index: 1, kind: input, shape index: {}]   ;;  %s442_s2 = inlined_call_operand.vmem [shape: f32[8,2,32], index: 2, kind: output, shape index: {}]  }
   0x1 LB: > { %s321_s10 = sadd.s32 4294967295, %s384_s9   ;;  %p325_p0 = scmp.ge.s32.totalorder %s384_s9, 1  ;;  %s384_s9 = sphi %s408_s9, %s12_s9  }
   0x2   : > { %p111_p1 = scmp.lt.s32.totalorder %s384_s9, 9 }
   0x4   : > { %p112_p2 = pnand %p325_p0, %p111_p1 }
   0x5   : > { %p131_p3 = scmp.lt.s32.totalorder (!%p112_p2), %s321_s10, 7  ;;  %p328_p4 = scmp.ne.s32.totalorder (!%p112_p2), %s321_s10, 0 }
   0x6   : > { %115 = sbr.rel (%p112_p2) target bundleno = 734 (0x2de), region = 28 }
   0xd   : > { %s132_s11 = scalar_select %p131_p3, %s321_s10, 7 }
   0xe   : > { %142 = sbr.rel (%p328_p4) target bundleno = 21 (0x15), region = 32  ;;  %vm143_vm0 = vcmask (!%p328_p4), 254976   ;;  %v386_v0 = vmov (!%p328_p4), 0.0  }
   0xf   : > { %s326_s12 = sshll.u32 %s132_s11, 1  ;;  %144 = vst.msk [vmem:[#allocation2] sm:$0x3] (!%p328_p4), %vm143_vm0, %v386_v0  ;;  %145 = vst.msk [vmem:[#allocation3] sm:$0x3] (!%p328_p4), %vm143_vm0, %v386_v0 }
  0x10   : > { %s134_s15 = scalar_lea.vmem %s440_s0, %s326_s12  ;;  %s422_s18 = scalar_lea.vmem %s442_s2, %s326_s12 }
  0x15 PF: > { %v148_v1 = vld [vmem:[%s441_s1] sm:$0xff]  ;;  %v149_v2 = vld [vmem:[%s441_s1 + $0x8] sm:$0xff]  ;;  %v150_v3 = vld [vmem:[%s441_s1 + $0x10] sm:$0xff]  ;;  %v387_v4 = vmov 0.0|0.0   ;;  %vm388_vm1 = vmmov 0   ;;  %v389_v7 = vmov 0.0  }
  0x16   : > { %349 = vmatprep.subr.bf16.mxu0 %v387_v4  ;;  %v350_v5 = vpack.c.bf16 %v149_v2, %v148_v1  ;;  %v151_v6 = vld [vmem:[%s441_s1 + $0x18] sm:$0xff]  ;;  %346 = vmatprep.mubr.msk.f32.mxu0 %vm388_vm1, %v389_v7  ;;  %v147_v9 = vld [vmem:[#allocation2] sm:$0x3]  ;;  %vm152_vm2 = vcmask 261120   ;;  %s390_s27 = smov 64   ;;  %s391_s28 = smov 32  }
  0x17   : > { %v353_v8 = vpack.c.bf16 %v151_v6, %v150_v3  ;;  %v146_v10 = vld [vmem:[%s134_s15] sm:$0x3]  ;;  %v234_v15 = vld [vmem:[#allocation3] sm:$0x3]  ;;  %s392_s29 = smov 96   ;;  %vm260_vm3 = vcmask 254976  }
  0x18   : > { %351 = vmatpush3.bf16.msra.mxu0 %v350_v5 }
  0x19   : > { %352 = vmatprep.subr.bf16.mxu0 %v387_v4 }
  0x1c   : > { %354 = vmatpush3.bf16.msra.mxu0 %v353_v8 }
  0x1f   : > { %347 = vmatmul.mubr.msk.f32.vlgmr.msra.gmra.mrb[0].mxu0 %vm152_vm2, %v147_v9 }
  0xf2   : > { %v222_v11 = vpop.f32.mrb[0].mxu0 }
  0xf3   : > { %v226_v12 = vadd.f32 %v222_v11, %v146_v10  ;;  %v348_v13 = vpop.f32.mrb[1].mxu0 }
  0xf5   : > { %370 = vtanh.f32 %v226_v12  ;;  %v330_v16 = vmul.f32 -1.442695, %v226_v12 }
  0xf7   : > { %372 = vpow2.f32 %v330_v16 }
  0xff   : > { %v371_v14 = vpop.eup %370 }
 0x100   : > { %241 = vrot.lane.b32.xlu0 %v371_v14, %s390_s27 }
 0x101   : > { %v373_v17 = vpop.eup %372 }
 0x102   : > { %v230_v18 = vadd.f32 1.0, %v373_v17 }
 0x104   : > { %236 = vrot.lane.b32.xlu0 %v234_v15, %s391_s28  ;;  %374 = vrcp.f32 %v230_v18 }
 0x10e   : > { %v375_v19 = vpop.eup %374 }
 0x172   : > { %v242_v20 = vpop.permute.xlu0 %241 }
 0x173   : > { %v244_v21 = vmul.f32 %v375_v19, %v242_v20 }
 0x175   : > { %246 = vrot.lane.b32.xlu1 %v244_v21, %s391_s28 }
 0x176   : > { %v237_v22 = vpop.permute.xlu0 %236 }
 0x177   : > { %v239_v23 = vmul.f32 %v375_v19, %v237_v22 }
 0x1e7   : > { %v247_v24 = vpop.permute.xlu1 %246 }
 0x1e8   : > { %v249_v25 = vadd.f32 %v247_v24, %v239_v23 }
 0x1ea   : > { %376 = vtanh.f32 %v249_v25  ;;  %257 = vrot.lane.b32.xlu0 %v249_v25, %s392_s29 }
 0x1f4   : > { %v377_v26 = vpop.eup %376 }
 0x1f5   : > { %252 = vrot.lane.b32.xlu1 %v377_v26, %s390_s27 }
 0x25c   : > { %v258_v27 = vpop.permute.xlu0 %257 }
 0x25d   : > { %261 = vst.msk [vmem:[#allocation3] sm:$0x3] %vm260_vm3, %v258_v27 }
 0x267   : > { %v253_v28 = vpop.permute.xlu1 %252 }
 0x268   : > { %v255_v29 = vmul.f32 %v375_v19, %v253_v28 }
 0x26a   : > { %263 = vrot.lane.b32.xlu1 %v255_v29, %s391_s28 }
 0x2dc   : > { %v264_v30 = vpop.permute.xlu1 %263 }
 0x2dd   : > { %266 = vst.msk [vmem:[#allocation2] sm:$0x3] %vm260_vm3, %v264_v30  ;;  %267 = vst.msk [vmem:[%s422_s18] sm:$0x3] %vm260_vm3, %v264_v30 }
 0x2de PF: > { %s12_s9 = sadd.s32 1, %s384_s9  }
 0x2df   : > { %p9_p5 = scmp.ge.s32.totalorder %s12_s9, 10  }
 0x2e1   :  { %11 = sbr.rel (!%p9_p5) target bundleno = 1 (0x1), region = 62 }

// kernel: hybrid_lstm_transformer_forward.16
= control target key start
LH: loop header
LB: loop body
LE: loop exit
PB: predicated region body
PF: predicated region fallthrough
CT: control target
= control target key end

     0   :  { %vm27_vm0 = vcmask 261120   ;;  %s190_s1 = inlined_call_operand.vmem [shape: f32[32,128], index: 1, kind: input, shape index: {}]   ;;  %s191_s0 = inlined_call_operand.vmem [shape: f32[16,32], index: 0, kind: input, shape index: {}]   ;;  %s192_s2 = inlined_call_operand.vmem [shape: f32[1,128], index: 2, kind: input, shape index: {}]   ;;  %s193_s3 = inlined_call_operand.vmem [shape: f32[16,128], index: 3, kind: output, shape index: {}]  }
   0x1   :  { %v16_v0 = vld [vmem:[%s190_s1] sm:$0xff]  ;;  %v17_v1 = vld [vmem:[%s190_s1 + $0x8] sm:$0xff]  ;;  %v18_v2 = vld [vmem:[%s190_s1 + $0x10] sm:$0xff] }
   0x2   :  { %v135_v3 = vpack.c.bf16 %v17_v1, %v16_v0  ;;  %v19_v4 = vld [vmem:[%s190_s1 + $0x18] sm:$0xff]  ;;  %v14_v5 = vld [vmem:[%s191_s0] sm:$0xff]  ;;  %v15_v7 = vld [vmem:[%s191_s0 + $0x8] sm:$0xff] }
   0x3   :  { %v139_v6 = vpack.c.bf16 %v19_v4, %v18_v2  ;;  %132 = vmatprep.mubr.msk.f32.mxu0 %vm27_vm0, %v14_v5  ;;  %v115_v8 = vld [vmem:[%s192_s2] ss:$0 sm:$0xff] }
   0x4   :  { %136 = vmatprep.subr.bf16.mxu0 %v135_v3 }
   0x5   :  { %138 = vmatpush3.bf16.msra.mxu0 %v135_v3 }
   0x6   :  { %140 = vmatprep.subr.bf16.mxu0 %v139_v6 }
   0x9   :  { %142 = vmatpush3.bf16.msra.mxu0 %v139_v6 }
   0xc   :  { %133 = vmatmul.mubr.msk.f32.vlgmr.msra.gmra.mrb[0].mxu0 %vm27_vm0, %v15_v7 }
  0xdf   :  { %v134_v9 = vpop.f32.mrb[0].mxu0 }
  0xe0   :  { %v106_v10 = vadd.f32 %v134_v9, %v115_v8  ;;  %v100_v11 = vpop.f32.mrb[1].mxu0 }
  0xe1   :  { %v101_v12 = vadd.f32 %v115_v8, %v100_v11 }
  0xe2   :  { %110 = vst [vmem:[%s193_s3 + $0x8] sm:$0xff] %v106_v10 }
  0xe3   :  { %109 = vst [vmem:[%s193_s3] sm:$0xff] %v101_v12 }

// kernel: hybrid_lstm_transformer_forward.27
= control target key start
LH: loop header
LB: loop body
LE: loop exit
PB: predicated region body
PF: predicated region fallthrough
CT: control target
= control target key end

     0   :  { %vm38_vm0 = vcmask 523264   ;;  %s469_s0 = inlined_call_operand.vmem [shape: f32[16,64], index: 0, kind: input, shape index: {}]   ;;  %s470_s1 = inlined_call_operand.vmem [shape: f32[64,64], index: 1, kind: input, shape index: {}]   ;;  %s471_s2 = inlined_call_operand.vmem [shape: f32[1,64], index: 2, kind: input, shape index: {}]   ;;  %s472_s3 = inlined_call_operand.vmem [shape: f32[64,8], index: 3, kind: input, shape index: {}]   ;;  %s473_s4 = inlined_call_operand.vmem [shape: f32[1,8], index: 4, kind: input, shape index: {}]   ;;  %s474_s5 = inlined_call_operand.hbm [shape: f32[16,8], index: 5, kind: output, shape index: {}]  }
   0x1   :  { %v23_v0 = vld [vmem:[%s470_s1] sm:$0xff]  ;;  %v24_v1 = vld [vmem:[%s470_s1 + $0x8] sm:$0xff]  ;;  %v25_v2 = vld [vmem:[%s470_s1 + $0x10] sm:$0xff] }
   0x2   :  { %v301_v3 = vpack.c.bf16 %v24_v1, %v23_v0  ;;  %v26_v4 = vld [vmem:[%s470_s1 + $0x18] sm:$0xff]  ;;  %v27_v6 = vld [vmem:[%s470_s1 + $0x20] sm:$0xff]  ;;  %v28_v7 = vld [vmem:[%s470_s1 + $0x28] sm:$0xff] }
   0x3   :  { %v305_v5 = vpack.c.bf16 %v26_v4, %v25_v2  ;;  %v21_v8 = vld [vmem:[%s469_s0] sm:$0xff]  ;;  %v123_v10 = vld [vmem:[%s472_s3 + $0x8] sm:$0xff]  ;;  %v124_v12 = vld [vmem:[%s472_s3 + $0x10] sm:$0xff]  ;;  %v309_v14 = vpack.c.bf16 %v28_v7, %v27_v6 }
   0x4   :  { %302 = vmatprep.subr.bf16.mxu0 %v301_v3  ;;  %279 = vmatprep.mubr.msk.f32.mxu0 %vm38_vm0, %v21_v8  ;;  %v122_v9 = vld [vmem:[%s472_s3] sm:$0xff]  ;;  %v125_v13 = vld [vmem:[%s472_s3 + $0x18] sm:$0xff]  ;;  %v127_v17 = vld [vmem:[%s472_s3 + $0x28] sm:$0xff] }
   0x5   :  { %304 = vmatpush3.bf16.msra.mxu0 %v301_v3  ;;  %v317_v11 = vpack.c.bf16 %v123_v10, %v122_v9  ;;  %v321_v15 = vpack.c.bf16 %v125_v13, %v124_v12  ;;  %v126_v16 = vld [vmem:[%s472_s3 + $0x20] sm:$0xff] }
   0x6   :  { %306 = vmatprep.subr.bf16.mxu0 %v305_v5 }
   0x7   :  { %10 = vsyncpa [#allocation3], 0  ;;  %v29_v18 = vld [vmem:[%s470_s1 + $0x30] sm:$0xff]  ;;  %v30_v19 = vld [vmem:[%s470_s1 + $0x38] sm:$0xff]  ;;  %318 = vmatprep.subr.bf16.mxu1 %v317_v11  ;;  %v325_v20 = vpack.c.bf16 %v127_v17, %v126_v16  ;;  %vm218_vm1 = vcmask 64512  }
   0x8   :  { %320 = vmatpush3.bf16.msra.mxu1 %v317_v11  ;;  %v313_v21 = vpack.c.bf16 %v30_v19, %v29_v18  ;;  %v22_v22 = vld [vmem:[%s469_s0 + $0x8] sm:$0xff]  ;;  %v128_v23 = vld [vmem:[%s472_s3 + $0x30] sm:$0xff]  ;;  %v129_v24 = vld [vmem:[%s472_s3 + $0x38] sm:$0xff]  ;;  %s360_s3 = smov [#allocation2]  }
   0x9   :  { %308 = vmatpush3.bf16.msra.mxu0 %v305_v5  ;;  %322 = vmatprep.subr.bf16.mxu1 %v321_v15  ;;  %v329_v25 = vpack.c.bf16 %v129_v24, %v128_v23  ;;  %v237_v26 = vld [vmem:[%s471_s2] ss:$0 sm:$0xff]  ;;  %s226_s6 = sshll.u32 %s360_s3, 4  ;;  %s227_s6 = int_to_ptr.vmem [resolvable:$true] %s226_s6 }
   0xa   :  { %310 = vmatprep.subr.bf16.mxu0 %v309_v14  ;;  %v240_v33 = vld [vmem:[%s473_s4] ss:$0 sm:$0xff]  ;;  %s336_s2 = scalar_lea.vmem %s227_s6, 256  ;;  %p341_p1 = scmp.lt.s32.totalorder %s227_s6, %s227_s6 }
   0xb   :  { %p337_p0 = scmp.ne.s32.totalorder %s227_s6, %s336_s2  ;;  %p342_p2 = scmp.lt.s32.totalorder %s336_s2, %s336_s2 }
   0xc   :  { %324 = vmatpush3.bf16.msra.mxu1 %v321_v15 }
   0xd   :  { %312 = vmatpush3.bf16.msra.mxu0 %v309_v14  ;;  %326 = vmatprep.subr.bf16.mxu1 %v325_v20  ;;  %p343_p3 = por %p342_p2, %p341_p1 }
   0xe   :  { %314 = vmatprep.subr.bf16.mxu0 %v313_v21 }
   0xf   :  { %p344_p4 = pnand %p343_p3, %p337_p0 }
  0x10   :  { %328 = vmatpush3.bf16.msra.mxu1 %v325_v20 }
  0x11   :  { %316 = vmatpush3.bf16.msra.mxu0 %v313_v21  ;;  %330 = vmatprep.subr.bf16.mxu1 %v329_v25 }
  0x14   :  { %280 = vmatmul.mubr.msk.f32.vlgmr.msra.gmra.mrb[0].mxu0 %vm38_vm0, %v22_v22  ;;  %332 = vmatpush3.bf16.msra.mxu1 %v329_v25 }
  0xe7   :  { %v281_v27 = vpop.f32.mrb[0].mxu0 }
  0xe8   :  { %v117_v28 = vadd.f32 %v281_v27, %v237_v26  ;;  %v111_v29 = vpop.f32.mrb[1].mxu0 }
  0xe9   :  { %v112_v30 = vadd.f32 %v237_v26, %v111_v29 }
  0xea   :  { %v121_v32 = vmax.f32 %v117_v28, 0.0 }
  0xeb   :  { %v120_v31 = vmax.f32 %v112_v30, 0.0 }
  0xed   :  { %298 = vmatprep.mubr.msk.f32.mxu1 %vm38_vm0, %v120_v31 }
  0xee   :  { %299 = vmatmul.mubr.msk.f32.vlgmr.msra.gmra.mrb[0].mxu1 %vm38_vm0, %v121_v32 }
 0x1c1   :  { %v300_v34 = vpop.f32.mrb[0].mxu1 }
 0x1c2   :  { %v215_v35 = vadd.f32 %v300_v34, %v240_v33  ;;  %v209_v36 = vpop.f32.mrb[1].mxu1 }
 0x1c3   :  { %v210_v37 = vadd.f32 %v240_v33, %v209_v36 }
 0x1c4   :  { %220 = vst.msk [vmem:[#allocation2 + $0x8] sm:$0xff] %vm218_vm1, %v215_v35 }
 0x1c5   :  { %219 = vst.msk [vmem:[#allocation2] sm:$0xff] %vm218_vm1, %v210_v37 }
 0x1c6   :  { %347 = shalt.err (!%p344_p4)
}
 0x1c7   :  { %s348_s4 = scalar_lea.hbm %s474_s5, 256 }
 0x1c8   :  { %p349_p5 = scmp.ne.s32.totalorder %s474_s5, %s348_s4  ;;  %p352_p6 = scmp.lt.u32.totalorder %s348_s4, %s474_s5 }
 0x1ca   :  { %p354_p7 = pnand %p352_p6, %p349_p5 }
 0x1cc   :  { %357 = shalt.err (!%p354_p7)
}
 0x1cd   :  { %s361_s13 = smov 128   ;;  %s362_s14 = smov 8  }
 0x1ce   :  { %232 = dma.vmem_to_hbm [thread:$0]  %s227_s6, 256, %s474_s5, [#allocation3], %s361_s13, %s361_s13, %s362_s14  }
 0x1cf   :  { %358 = dma.done.wait [#allocation3], 256  }
 0x1d0   :  { %359 = vsyncadd [#allocation3], 4294967040 }
 0x1d1   :  { %236 = vsyncpa [#allocation3], 1 }

</bundles_post_ra>
